<compile_context>
chip_gen: v6e
topology: v6e:2x2x1
jax: 0.10.0
libtpu: 0.0.40
codegen_flags: <defaults>
</compile_context>

<pallas_src>
import math
import functools

import jax
import jax.numpy as jnp
import numpy as np
from jax.experimental import pallas as pl
from jax.experimental.pallas import tpu as pltpu

NEG_INF = float(np.finfo(np.float32).min)

# Weight matrices stored/transferred in bf16 (halves DMA + feeds MXU natively).
WEIGHT_KEYS = frozenset({
    "s_wq", "s_wk", "s_wv", "s_wo",
    "c_wq", "c_wk", "c_wv", "c_wo",
    "f_w1", "f_w2",
})

PARAM_ORDER = [
    "ln1_g", "ln1_b", "ln2_g", "ln2_b", "ln3_g", "ln3_b",
    "s_wq", "s_bq", "s_wk", "s_bk", "s_wv", "s_bv", "s_wo", "s_bo",
    "c_wq", "c_bq", "c_wk", "c_bk", "c_wv", "c_bv", "c_wo", "c_bo",
    "f_w1", "f_b1", "f_w2", "f_b2",
]


def _layer_norm(x, gamma, beta, eps):
    mean = jnp.mean(x, axis=-1, keepdims=True)
    var = jnp.mean((x - mean) ** 2, axis=-1, keepdims=True)
    return (x - mean) * jax.lax.rsqrt(var + eps) * gamma + beta


def decoder_block_kernel(
    # data inputs (per-batch blocks)
    ys_ref, xs_ref, yy_mask_ref, xy_mask_ref,
    # layer norm params (f32)
    ln1_g_ref, ln1_b_ref, ln2_g_ref, ln2_b_ref, ln3_g_ref, ln3_b_ref,
    # self-attention params (weights bf16, biases f32)
    s_wq_ref, s_bq_ref, s_wk_ref, s_bk_ref, s_wv_ref, s_bv_ref, s_wo_ref, s_bo_ref,
    # source-target attention params
    c_wq_ref, c_bq_ref, c_wk_ref, c_bk_ref, c_wv_ref, c_bv_ref, c_wo_ref, c_bo_ref,
    # FFN params
    f_w1_ref, f_b1_ref, f_w2_ref, f_b2_ref,
    # outputs
    out_ref, yy_aws_ref, xy_aws_ref,
    # scratch: (L, D) f32 context slab shared by both attentions
    ctx_ref,
    *, n_heads, d_k, eps,
):
    bf16 = jnp.bfloat16
    f32 = jnp.float32

    ys = ys_ref[0]                       # (L, D) f32
    xs = xs_ref[0]                       # (T, D) f32
    yy_keep = yy_mask_ref[0] > 0.0       # (L, L) bool  (hoisted compare)
    xy_keep = xy_mask_ref[0] > 0.0       # (L, T) bool
    inv_scale = 1.0 / math.sqrt(d_k)

    def split_heads(x_f32):
        # (L*, D) f32 -> (H, L*, d_k) bf16; lane slices stacked on a new major
        # axis (no lane-dim concatenate on the output side).
        pieces = [x_f32[None, :, h * d_k:(h + 1) * d_k] for h in range(n_heads)]
        return jnp.concatenate(pieces, axis=0).astype(bf16)

    def mha(kv_in, q_in, keep, wq_ref, bq_ref, wk_ref, bk_ref,
            wv_ref, bv_ref, wo_ref, bo_ref, aw_ref):
        kv_b = kv_in.astype(bf16)
        q_b = q_in.astype(bf16)

        # Full-width projections on the MXU (bf16 in, f32 accumulate).
        q = jnp.dot(q_b, wq_ref[...], preferred_element_type=f32) + bq_ref[...]
        k = jnp.dot(kv_b, wk_ref[...], preferred_element_type=f32) + bk_ref[...]
        v = jnp.dot(kv_b, wv_ref[...], preferred_element_type=f32) + bv_ref[...]

        # Head-batched attention: (H, Lq, d_k) x (H, Lk, d_k).
        qh = split_heads(q * inv_scale)          # scale folded into q (cheaper)
        kh = split_heads(k)
        vh = split_heads(v)

        scores = jnp.einsum('hqd,hkd->hqk', qh, kh,
                            preferred_element_type=f32)          # (H, Lq, Lk)
        scores = jnp.where(keep[None], scores, NEG_INF)          # single select
        m = jnp.max(scores, axis=-1, keepdims=True)
        e = jnp.exp(scores - m)
        aw = e * pl.reciprocal(jnp.sum(e, axis=-1, keepdims=True), approx=True)

        aw_ref[0] = aw                                            # single store

        ctx = jnp.einsum('hqk,hkd->hqd', aw.astype(bf16), vh,
                         preferred_element_type=f32)              # (H, Lq, d_k)
        # Scatter heads into the (L, D) VMEM slab (no lane concatenate).
        for h in range(n_heads):
            ctx_ref[:, h * d_k:(h + 1) * d_k] = ctx[h]

        cv = ctx_ref[...].astype(bf16)
        return jnp.dot(cv, wo_ref[...], preferred_element_type=f32) + bo_ref[...]

    # ---- self-attention sublayer ----
    residual = ys
    ysn = _layer_norm(ys, ln1_g_ref[...], ln1_b_ref[...], eps)
    out = mha(ysn, ysn, yy_keep,
              s_wq_ref, s_bq_ref, s_wk_ref, s_bk_ref,
              s_wv_ref, s_bv_ref, s_wo_ref, s_bo_ref,
              yy_aws_ref)
    out = out + residual

    # ---- source-target attention sublayer ----
    residual = out
    outn = _layer_norm(out, ln2_g_ref[...], ln2_b_ref[...], eps)
    out = mha(xs, outn, xy_keep,
              c_wq_ref, c_bq_ref, c_wk_ref, c_bk_ref,
              c_wv_ref, c_bv_ref, c_wo_ref, c_bo_ref,
              xy_aws_ref)
    out = out + residual

    # ---- position-wise feed forward sublayer ----
    residual = out
    outn = _layer_norm(out, ln3_g_ref[...], ln3_b_ref[...], eps)
    h1 = jnp.dot(outn.astype(bf16), f_w1_ref[...],
                 preferred_element_type=f32) + f_b1_ref[...]
    h1 = jnp.maximum(h1, 0.0)  # relu (ffn_activation='relu')
    ff = jnp.dot(h1.astype(bf16), f_w2_ref[...],
                 preferred_element_type=f32) + f_b2_ref[...]
    out_ref[0] = ff + residual


def transformer_decoder_block(ys, xs, yy_mask, xy_mask, params, *, n_heads,
                              eps=1e-12):
    B, L, D = ys.shape
    T = xs.shape[1]
    assert D % n_heads == 0
    d_k = D // n_heads

    # Weight matrices in bf16 (MXU-native, half the DMA/VMEM), everything
    # else (LN params, biases) stays f32.
    param_arrays = []
    for name in PARAM_ORDER:
        p = params[name]
        if name in WEIGHT_KEYS:
            p = p.astype(jnp.bfloat16)
        param_arrays.append(p)

    data_specs = [
        pl.BlockSpec((1, L, D), lambda b: (b, 0, 0)),
        pl.BlockSpec((1, T, D), lambda b: (b, 0, 0)),
        pl.BlockSpec((1, L, L), lambda b: (b, 0, 0)),
        pl.BlockSpec((1, L, T), lambda b: (b, 0, 0)),
    ]

    # Constant-index params: single-buffer them (no need to double-buffer a
    # block whose index never changes) to halve their VMEM footprint.
    param_kwargs = {}
    if hasattr(pl, "Buffered"):
        param_kwargs = dict(pipeline_mode=pl.Buffered(1))

    def param_spec(arr):
        nd = arr.ndim
        return pl.BlockSpec(arr.shape, lambda b, _nd=nd: (0,) * _nd,
                            **param_kwargs)

    param_specs = [param_spec(p) for p in param_arrays]

    out_shapes = (
        jax.ShapeDtypeStruct((B, L, D), jnp.float32),
        jax.ShapeDtypeStruct((B, n_heads, L, L), jnp.float32),
        jax.ShapeDtypeStruct((B, n_heads, L, T), jnp.float32),
    )
    out_specs = [
        pl.BlockSpec((1, L, D), lambda b: (b, 0, 0)),
        pl.BlockSpec((1, n_heads, L, L), lambda b: (b, 0, 0, 0)),
        pl.BlockSpec((1, n_heads, L, T), lambda b: (b, 0, 0, 0)),
    ]

    kernel = functools.partial(decoder_block_kernel,
                               n_heads=n_heads, d_k=d_k, eps=eps)

    return pl.pallas_call(
        kernel,
        out_shape=out_shapes,
        grid_spec=pltpu.PrefetchScalarGridSpec(
            num_scalar_prefetch=0,
            grid=(B,),
            in_specs=data_specs + param_specs,
            out_specs=out_specs,
            scratch_shapes=[pltpu.VMEM((L, D), jnp.float32)],
        ),
        compiler_params=pltpu.CompilerParams(
            # batch elements are independent -> shard across v7x's 2 cores
            dimension_semantics=("parallel",),
            # explicit budget with headroom (v7x has 64 MiB physical VMEM)
            vmem_limit_bytes=48 * 1024 * 1024,
        ),
    )(ys, xs, yy_mask, xy_mask, *param_arrays)


# ---------------- pure-JAX reference (mirrors the kernel's bf16 MXU math) ----
def reference_block(ys, xs, yy_mask, xy_mask, params, *, n_heads, eps=1e-12):
    bf16 = jnp.bfloat16

    def bdot(a, b):
        return jnp.dot(a.astype(bf16), b.astype(bf16),
                       preferred_element_type=jnp.float32)

    def ln(x, g, b):
        m = x.mean(-1, keepdims=True)
        v = ((x - m) ** 2).mean(-1, keepdims=True)
        return (x - m) / jnp.sqrt(v + eps) * g + b

    def mha(k_in, v_in, q_in, mask, wq, bq, wk, bk, wv, bv, wo, bo):
        B, Lq, D = q_in.shape
        Lk = k_in.shape[1]
        d_k = D // n_heads
        q = (bdot(q_in, wq) + bq).reshape(B, Lq, n_heads, d_k).transpose(0, 2, 1, 3)
        k = (bdot(k_in, wk) + bk).reshape(B, Lk, n_heads, d_k).transpose(0, 2, 1, 3)
        v = (bdot(v_in, wv) + bv).reshape(B, Lk, n_heads, d_k).transpose(0, 2, 1, 3)
        scores = jnp.einsum('bhqd,bhkd->bhqk', q.astype(bf16), k.astype(bf16),
                            preferred_element_type=jnp.float32) / math.sqrt(d_k)
        scores = jnp.where(mask[:, None] > 0, scores, NEG_INF)
        aw = jax.nn.softmax(scores, axis=-1)
        ctx = jnp.einsum('bhqk,bhkd->bhqd', aw.astype(bf16), v.astype(bf16),
                         preferred_element_type=jnp.float32)
        ctx = ctx.transpose(0, 2, 1, 3).reshape(B, Lq, D)
        return bdot(ctx, wo) + bo, aw

    p = params
    residual = ys
    y = ln(ys, p["ln1_g"], p["ln1_b"])
    out, yy_aws = mha(y, y, y, yy_mask,
                      p["s_wq"], p["s_bq"], p["s_wk"], p["s_bk"],
                      p["s_wv"], p["s_bv"], p["s_wo"], p["s_bo"])
    out = out + residual

    residual = out
    o = ln(out, p["ln2_g"], p["ln2_b"])
    out, xy_aws = mha(xs, xs, o, xy_mask,
                      p["c_wq"], p["c_bq"], p["c_wk"], p["c_bk"],
                      p["c_wv"], p["c_bv"], p["c_wo"], p["c_bo"])
    out = out + residual

    residual = out
    o = ln(out, p["ln3_g"], p["ln3_b"])
    h = jnp.maximum(bdot(o, p["f_w1"]) + p["f_b1"], 0.0)
    out = bdot(h, p["f_w2"]) + p["f_b2"] + residual
    return out, yy_aws, xy_aws


def init_params(key, d_model, d_ff):
    def lin(key, fan_in, fan_out):
        kw, kb = jax.random.split(key)
        w = jax.random.normal(kw, (fan_in, fan_out), jnp.float32) / math.sqrt(fan_in)
        b = jax.random.normal(kb, (1, fan_out), jnp.float32) * 0.02
        return w, b

    keys = jax.random.split(key, 16)
    params = {
        "ln1_g": jnp.ones((1, d_model), jnp.float32),
        "ln1_b": jnp.zeros((1, d_model), jnp.float32),
        "ln2_g": jnp.ones((1, d_model), jnp.float32),
        "ln2_b": jnp.zeros((1, d_model), jnp.float32),
        "ln3_g": jnp.ones((1, d_model), jnp.float32),
        "ln3_b": jnp.zeros((1, d_model), jnp.float32),
    }
    params["s_wq"], params["s_bq"] = lin(keys[0], d_model, d_model)
    params["s_wk"], params["s_bk"] = lin(keys[1], d_model, d_model)
    params["s_wv"], params["s_bv"] = lin(keys[2], d_model, d_model)
    params["s_wo"], params["s_bo"] = lin(keys[3], d_model, d_model)
    params["c_wq"], params["c_bq"] = lin(keys[4], d_model, d_model)
    params["c_wk"], params["c_bk"] = lin(keys[5], d_model, d_model)
    params["c_wv"], params["c_bv"] = lin(keys[6], d_model, d_model)
    params["c_wo"], params["c_bo"] = lin(keys[7], d_model, d_model)
    params["f_w1"], params["f_b1"] = lin(keys[8], d_model, d_ff)
    params["f_w2"], params["f_b2"] = lin(keys[9], d_ff, d_model)
    return params


if __name__ == "__main__":
    B, L, T = 2, 8, 16
    d_model, d_ff, n_heads = 32, 64, 4
    eps = 1e-12

    key = jax.random.PRNGKey(0)
    k_ys, k_xs, k_par = jax.random.split(key, 3)

    ys = jax.random.normal(k_ys, (B, L, d_model), jnp.float32)
    xs = jax.random.normal(k_xs, (B, T, d_model), jnp.float32)

    # causal self-attention mask (1 = attend), full cross-attention mask
    yy_mask = jnp.tril(jnp.ones((L, L), jnp.float32))[None].repeat(B, axis=0)
    xy_mask = jnp.ones((B, L, T), jnp.float32)

    params = init_params(k_par, d_model, d_ff)

    out, yy_aws, xy_aws = transformer_decoder_block(
        ys, xs, yy_mask, xy_mask, params, n_heads=n_heads, eps=eps)
    jax.block_until_ready((out, yy_aws, xy_aws))

    out_ref, yy_ref, xy_ref = reference_block(
        ys, xs, yy_mask, xy_mask, params, n_heads=n_heads, eps=eps)

    # Tolerances account for bf16 MXU compute + approximate EUP reciprocal.
    np.testing.assert_allclose(np.asarray(out), np.asarray(out_ref),
                               rtol=2e-2, atol=2e-2)
    np.testing.assert_allclose(np.asarray(yy_aws), np.asarray(yy_ref),
                               rtol=2e-2, atol=2e-2)
    np.testing.assert_allclose(np.asarray(xy_aws), np.asarray(xy_ref),
                               rtol=2e-2, atol=2e-2)

    print("KERNEL_OK")
</pallas_src>

<mosaic_0001>
module attributes {stable_mosaic.version = 11 : i64} {
  func.func @decoder_block_kernel(%arg0: i32, %arg1: memref<1x8x32xf32, #tpu.memory_space<vmem>>, %arg2: memref<1x16x32xf32, #tpu.memory_space<vmem>>, %arg3: memref<1x8x8xf32, #tpu.memory_space<vmem>>, %arg4: memref<1x8x16xf32, #tpu.memory_space<vmem>>, %arg5: memref<1x32xf32, #tpu.memory_space<vmem>>, %arg6: memref<1x32xf32, #tpu.memory_space<vmem>>, %arg7: memref<1x32xf32, #tpu.memory_space<vmem>>, %arg8: memref<1x32xf32, #tpu.memory_space<vmem>>, %arg9: memref<1x32xf32, #tpu.memory_space<vmem>>, %arg10: memref<1x32xf32, #tpu.memory_space<vmem>>, %arg11: memref<32x32xbf16, #tpu.memory_space<vmem>>, %arg12: memref<1x32xf32, #tpu.memory_space<vmem>>, %arg13: memref<32x32xbf16, #tpu.memory_space<vmem>>, %arg14: memref<1x32xf32, #tpu.memory_space<vmem>>, %arg15: memref<32x32xbf16, #tpu.memory_space<vmem>>, %arg16: memref<1x32xf32, #tpu.memory_space<vmem>>, %arg17: memref<32x32xbf16, #tpu.memory_space<vmem>>, %arg18: memref<1x32xf32, #tpu.memory_space<vmem>>, %arg19: memref<32x32xbf16, #tpu.memory_space<vmem>>, %arg20: memref<1x32xf32, #tpu.memory_space<vmem>>, %arg21: memref<32x32xbf16, #tpu.memory_space<vmem>>, %arg22: memref<1x32xf32, #tpu.memory_space<vmem>>, %arg23: memref<32x32xbf16, #tpu.memory_space<vmem>>, %arg24: memref<1x32xf32, #tpu.memory_space<vmem>>, %arg25: memref<32x32xbf16, #tpu.memory_space<vmem>>, %arg26: memref<1x32xf32, #tpu.memory_space<vmem>>, %arg27: memref<32x64xbf16, #tpu.memory_space<vmem>>, %arg28: memref<1x64xf32, #tpu.memory_space<vmem>>, %arg29: memref<64x32xbf16, #tpu.memory_space<vmem>>, %arg30: memref<1x32xf32, #tpu.memory_space<vmem>>, %arg31: memref<1x8x32xf32, #tpu.memory_space<vmem>>, %arg32: memref<1x4x8x8xf32, #tpu.memory_space<vmem>>, %arg33: memref<1x4x8x16xf32, #tpu.memory_space<vmem>>, %arg34: memref<8x32xf32, #tpu.memory_space<vmem>>) attributes {dimension_semantics = [#tpu.dimension_semantics<parallel>], iteration_bounds = array<i64: 2>, scalar_prefetch = 0 : i64, scratch_operands = 1 : i64, tpu.core_type = #tpu.core_type<tc>, window_params = [{transform_indices = @transform_0, window_bounds = array<i64: 1, 8, 32>}, {transform_indices = @transform_1, window_bounds = array<i64: 1, 16, 32>}, {transform_indices = @transform_2, window_bounds = array<i64: 1, 8, 8>}, {transform_indices = @transform_3, window_bounds = array<i64: 1, 8, 16>}, {pipeline_mode = #tpu.pipeline_mode<synchronous>, transform_indices = @transform_4, window_bounds = array<i64: 1, 32>}, {pipeline_mode = #tpu.pipeline_mode<synchronous>, transform_indices = @transform_5, window_bounds = array<i64: 1, 32>}, {pipeline_mode = #tpu.pipeline_mode<synchronous>, transform_indices = @transform_6, window_bounds = array<i64: 1, 32>}, {pipeline_mode = #tpu.pipeline_mode<synchronous>, transform_indices = @transform_7, window_bounds = array<i64: 1, 32>}, {pipeline_mode = #tpu.pipeline_mode<synchronous>, transform_indices = @transform_8, window_bounds = array<i64: 1, 32>}, {pipeline_mode = #tpu.pipeline_mode<synchronous>, transform_indices = @transform_9, window_bounds = array<i64: 1, 32>}, {pipeline_mode = #tpu.pipeline_mode<synchronous>, transform_indices = @transform_10, window_bounds = array<i64: 32, 32>}, {pipeline_mode = #tpu.pipeline_mode<synchronous>, transform_indices = @transform_11, window_bounds = array<i64: 1, 32>}, {pipeline_mode = #tpu.pipeline_mode<synchronous>, transform_indices = @transform_12, window_bounds = array<i64: 32, 32>}, {pipeline_mode = #tpu.pipeline_mode<synchronous>, transform_indices = @transform_13, window_bounds = array<i64: 1, 32>}, {pipeline_mode = #tpu.pipeline_mode<synchronous>, transform_indices = @transform_14, window_bounds = array<i64: 32, 32>}, {pipeline_mode = #tpu.pipeline_mode<synchronous>, transform_indices = @transform_15, window_bounds = array<i64: 1, 32>}, {pipeline_mode = #tpu.pipeline_mode<synchronous>, transform_indices = @transform_16, window_bounds = array<i64: 32, 32>}, {pipeline_mode = #tpu.pipeline_mode<synchronous>, transform_indices = @transform_17, window_bounds = array<i64: 1, 32>}, {pipeline_mode = #tpu.pipeline_mode<synchronous>, transform_indices = @transform_18, window_bounds = array<i64: 32, 32>}, {pipeline_mode = #tpu.pipeline_mode<synchronous>, transform_indices = @transform_19, window_bounds = array<i64: 1, 32>}, {pipeline_mode = #tpu.pipeline_mode<synchronous>, transform_indices = @transform_20, window_bounds = array<i64: 32, 32>}, {pipeline_mode = #tpu.pipeline_mode<synchronous>, transform_indices = @transform_21, window_bounds = array<i64: 1, 32>}, {pipeline_mode = #tpu.pipeline_mode<synchronous>, transform_indices = @transform_22, window_bounds = array<i64: 32, 32>}, {pipeline_mode = #tpu.pipeline_mode<synchronous>, transform_indices = @transform_23, window_bounds = array<i64: 1, 32>}, {pipeline_mode = #tpu.pipeline_mode<synchronous>, transform_indices = @transform_24, window_bounds = array<i64: 32, 32>}, {pipeline_mode = #tpu.pipeline_mode<synchronous>, transform_indices = @transform_25, window_bounds = array<i64: 1, 32>}, {pipeline_mode = #tpu.pipeline_mode<synchronous>, transform_indices = @transform_26, window_bounds = array<i64: 32, 64>}, {pipeline_mode = #tpu.pipeline_mode<synchronous>, transform_indices = @transform_27, window_bounds = array<i64: 1, 64>}, {pipeline_mode = #tpu.pipeline_mode<synchronous>, transform_indices = @transform_28, window_bounds = array<i64: 64, 32>}, {pipeline_mode = #tpu.pipeline_mode<synchronous>, transform_indices = @transform_29, window_bounds = array<i64: 1, 32>}, {transform_indices = @transform_30, window_bounds = array<i64: 1, 8, 32>}, {transform_indices = @transform_31, window_bounds = array<i64: 1, 4, 8, 8>}, {transform_indices = @transform_32, window_bounds = array<i64: 1, 4, 8, 16>}]} {
    %c0 = arith.constant 0 : index
    %c0_0 = arith.constant 0 : index
    %c0_1 = arith.constant 0 : index
    %0 = vector.load %arg1[%c0, %c0_0, %c0_1] : memref<1x8x32xf32, #tpu.memory_space<vmem>>, vector<1x8x32xf32>
    %1 = vector.shape_cast %0 : vector<1x8x32xf32> to vector<8x32xf32>
    %c0_2 = arith.constant 0 : index
    %c0_3 = arith.constant 0 : index
    %c0_4 = arith.constant 0 : index
    %2 = vector.load %arg2[%c0_2, %c0_3, %c0_4] : memref<1x16x32xf32, #tpu.memory_space<vmem>>, vector<1x16x32xf32>
    %3 = vector.shape_cast %2 : vector<1x16x32xf32> to vector<16x32xf32>
    %c0_5 = arith.constant 0 : index
    %c0_6 = arith.constant 0 : index
    %c0_7 = arith.constant 0 : index
    %4 = vector.load %arg3[%c0_5, %c0_6, %c0_7] : memref<1x8x8xf32, #tpu.memory_space<vmem>>, vector<1x8x8xf32>
    %5 = vector.shape_cast %4 : vector<1x8x8xf32> to vector<8x8xf32>
    %cst = arith.constant 0.000000e+00 : f32
    %6 = vector.broadcast %cst : f32 to vector<8x8xf32>
    %7 = arith.cmpf ogt, %5, %6 : vector<8x8xf32>
    %c0_8 = arith.constant 0 : index
    %c0_9 = arith.constant 0 : index
    %c0_10 = arith.constant 0 : index
    %8 = vector.load %arg4[%c0_8, %c0_9, %c0_10] : memref<1x8x16xf32, #tpu.memory_space<vmem>>, vector<1x8x16xf32>
    %9 = vector.shape_cast %8 : vector<1x8x16xf32> to vector<8x16xf32>
    %cst_11 = arith.constant 0.000000e+00 : f32
    %10 = vector.broadcast %cst_11 : f32 to vector<8x16xf32>
    %11 = arith.cmpf ogt, %9, %10 : vector<8x16xf32>
    %c0_12 = arith.constant 0 : index
    %c0_13 = arith.constant 0 : index
    %12 = vector.load %arg5[%c0_12, %c0_13] : memref<1x32xf32, #tpu.memory_space<vmem>>, vector<1x32xf32>
    %c0_14 = arith.constant 0 : index
    %c0_15 = arith.constant 0 : index
    %13 = vector.load %arg6[%c0_14, %c0_15] : memref<1x32xf32, #tpu.memory_space<vmem>>, vector<1x32xf32>
    %cst_16 = arith.constant dense<0.000000e+00> : vector<8xf32>
    %14 = vector.multi_reduction <add>, %1, %cst_16 [1] : vector<8x32xf32> to vector<8xf32>
    %15 = vector.shape_cast %14 : vector<8xf32> to vector<8x1xf32>
    %cst_17 = arith.constant 3.200000e+01 : f32
    %16 = vector.broadcast %cst_17 : f32 to vector<8x1xf32>
    %17 = arith.divf %15, %16 : vector<8x1xf32>
    %18 = vector.broadcast %17 : vector<8x1xf32> to vector<8x32xf32>
    %19 = arith.subf %1, %18 : vector<8x32xf32>
    %20 = arith.mulf %19, %19 : vector<8x32xf32>
    %cst_18 = arith.constant dense<0.000000e+00> : vector<8xf32>
    %21 = vector.multi_reduction <add>, %20, %cst_18 [1] : vector<8x32xf32> to vector<8xf32>
    %22 = vector.shape_cast %21 : vector<8xf32> to vector<8x1xf32>
    %cst_19 = arith.constant 3.200000e+01 : f32
    %23 = vector.broadcast %cst_19 : f32 to vector<8x1xf32>
    %24 = arith.divf %22, %23 : vector<8x1xf32>
    %25 = vector.broadcast %17 : vector<8x1xf32> to vector<8x32xf32>
    %26 = arith.subf %1, %25 : vector<8x32xf32>
    %cst_20 = arith.constant 9.99999996E-13 : f32
    %27 = vector.broadcast %cst_20 : f32 to vector<8x1xf32>
    %28 = arith.addf %24, %27 : vector<8x1xf32>
    %29 = math.rsqrt %28 : vector<8x1xf32>
    %30 = vector.broadcast %29 : vector<8x1xf32> to vector<8x32xf32>
    %31 = arith.mulf %26, %30 : vector<8x32xf32>
    %32 = vector.broadcast %12 : vector<1x32xf32> to vector<8x32xf32>
    %33 = arith.mulf %31, %32 : vector<8x32xf32>
    %34 = vector.broadcast %13 : vector<1x32xf32> to vector<8x32xf32>
    %35 = arith.addf %33, %34 : vector<8x32xf32>
    %36 = arith.truncf %35 : vector<8x32xf32> to vector<8x32xbf16>
    %37 = arith.truncf %35 : vector<8x32xf32> to vector<8x32xbf16>
    %c0_21 = arith.constant 0 : index
    %c0_22 = arith.constant 0 : index
    %38 = vector.load %arg11[%c0_21, %c0_22] : memref<32x32xbf16, #tpu.memory_space<vmem>>, vector<32x32xbf16>
    %cst_23 = arith.constant dense<0.000000e+00> : vector<8x32xf32>
    %39 = tpu.matmul %37, %38, %cst_23 {dimension_numbers = #tpu.dot_dimension_numbers<[1], [0], [0], [1], [0, 0, 1, 1], [], []>} : vector<8x32xbf16>, vector<32x32xbf16>, vector<8x32xf32> -> vector<8x32xf32>
    %c0_24 = arith.constant 0 : index
    %c0_25 = arith.constant 0 : index
    %40 = vector.load %arg12[%c0_24, %c0_25] : memref<1x32xf32, #tpu.memory_space<vmem>>, vector<1x32xf32>
    %41 = vector.broadcast %40 : vector<1x32xf32> to vector<8x32xf32>
    %42 = arith.addf %39, %41 : vector<8x32xf32>
    %c0_26 = arith.constant 0 : index
    %c0_27 = arith.constant 0 : index
    %43 = vector.load %arg13[%c0_26, %c0_27] : memref<32x32xbf16, #tpu.memory_space<vmem>>, vector<32x32xbf16>
    %cst_28 = arith.constant dense<0.000000e+00> : vector<8x32xf32>
    %44 = tpu.matmul %36, %43, %cst_28 {dimension_numbers = #tpu.dot_dimension_numbers<[1], [0], [0], [1], [0, 0, 1, 1], [], []>} : vector<8x32xbf16>, vector<32x32xbf16>, vector<8x32xf32> -> vector<8x32xf32>
    %c0_29 = arith.constant 0 : index
    %c0_30 = arith.constant 0 : index
    %45 = vector.load %arg14[%c0_29, %c0_30] : memref<1x32xf32, #tpu.memory_space<vmem>>, vector<1x32xf32>
    %46 = vector.broadcast %45 : vector<1x32xf32> to vector<8x32xf32>
    %47 = arith.addf %44, %46 : vector<8x32xf32>
    %c0_31 = arith.constant 0 : index
    %c0_32 = arith.constant 0 : index
    %48 = vector.load %arg15[%c0_31, %c0_32] : memref<32x32xbf16, #tpu.memory_space<vmem>>, vector<32x32xbf16>
    %cst_33 = arith.constant dense<0.000000e+00> : vector<8x32xf32>
    %49 = tpu.matmul %36, %48, %cst_33 {dimension_numbers = #tpu.dot_dimension_numbers<[1], [0], [0], [1], [0, 0, 1, 1], [], []>} : vector<8x32xbf16>, vector<32x32xbf16>, vector<8x32xf32> -> vector<8x32xf32>
    %c0_34 = arith.constant 0 : index
    %c0_35 = arith.constant 0 : index
    %50 = vector.load %arg16[%c0_34, %c0_35] : memref<1x32xf32, #tpu.memory_space<vmem>>, vector<1x32xf32>
    %51 = vector.broadcast %50 : vector<1x32xf32> to vector<8x32xf32>
    %52 = arith.addf %49, %51 : vector<8x32xf32>
    %cst_36 = arith.constant 0.353553385 : f32
    %53 = vector.broadcast %cst_36 : f32 to vector<8x32xf32>
    %54 = arith.mulf %42, %53 : vector<8x32xf32>
    %55 = vector.extract_strided_slice %54 {offsets = [0, 0], sizes = [8, 8], strides = [1, 1]} : vector<8x32xf32> to vector<8x8xf32>
    %56 = vector.shape_cast %55 : vector<8x8xf32> to vector<1x8x8xf32>
    %57 = vector.extract_strided_slice %54 {offsets = [0, 8], sizes = [8, 8], strides = [1, 1]} : vector<8x32xf32> to vector<8x8xf32>
    %58 = vector.shape_cast %57 : vector<8x8xf32> to vector<1x8x8xf32>
    %59 = vector.extract_strided_slice %54 {offsets = [0, 16], sizes = [8, 8], strides = [1, 1]} : vector<8x32xf32> to vector<8x8xf32>
    %60 = vector.shape_cast %59 : vector<8x8xf32> to vector<1x8x8xf32>
    %61 = vector.extract_strided_slice %54 {offsets = [0, 24], sizes = [8, 8], strides = [1, 1]} : vector<8x32xf32> to vector<8x8xf32>
    %62 = vector.shape_cast %61 : vector<8x8xf32> to vector<1x8x8xf32>
    %63 = tpu.concatenate %56, %58, %60, %62 in 0 : vector<1x8x8xf32>, vector<1x8x8xf32>, vector<1x8x8xf32>, vector<1x8x8xf32> -> vector<4x8x8xf32>
    %64 = arith.truncf %63 : vector<4x8x8xf32> to vector<4x8x8xbf16>
    %65 = vector.extract_strided_slice %47 {offsets = [0, 0], sizes = [8, 8], strides = [1, 1]} : vector<8x32xf32> to vector<8x8xf32>
    %66 = vector.shape_cast %65 : vector<8x8xf32> to vector<1x8x8xf32>
    %67 = vector.extract_strided_slice %47 {offsets = [0, 8], sizes = [8, 8], strides = [1, 1]} : vector<8x32xf32> to vector<8x8xf32>
    %68 = vector.shape_cast %67 : vector<8x8xf32> to vector<1x8x8xf32>
    %69 = vector.extract_strided_slice %47 {offsets = [0, 16], sizes = [8, 8], strides = [1, 1]} : vector<8x32xf32> to vector<8x8xf32>
    %70 = vector.shape_cast %69 : vector<8x8xf32> to vector<1x8x8xf32>
    %71 = vector.extract_strided_slice %47 {offsets = [0, 24], sizes = [8, 8], strides = [1, 1]} : vector<8x32xf32> to vector<8x8xf32>
    %72 = vector.shape_cast %71 : vector<8x8xf32> to vector<1x8x8xf32>
    %73 = tpu.concatenate %66, %68, %70, %72 in 0 : vector<1x8x8xf32>, vector<1x8x8xf32>, vector<1x8x8xf32>, vector<1x8x8xf32> -> vector<4x8x8xf32>
    %74 = arith.truncf %73 : vector<4x8x8xf32> to vector<4x8x8xbf16>
    %75 = vector.extract_strided_slice %52 {offsets = [0, 0], sizes = [8, 8], strides = [1, 1]} : vector<8x32xf32> to vector<8x8xf32>
    %76 = vector.shape_cast %75 : vector<8x8xf32> to vector<1x8x8xf32>
    %77 = vector.extract_strided_slice %52 {offsets = [0, 8], sizes = [8, 8], strides = [1, 1]} : vector<8x32xf32> to vector<8x8xf32>
    %78 = vector.shape_cast %77 : vector<8x8xf32> to vector<1x8x8xf32>
    %79 = vector.extract_strided_slice %52 {offsets = [0, 16], sizes = [8, 8], strides = [1, 1]} : vector<8x32xf32> to vector<8x8xf32>
    %80 = vector.shape_cast %79 : vector<8x8xf32> to vector<1x8x8xf32>
    %81 = vector.extract_strided_slice %52 {offsets = [0, 24], sizes = [8, 8], strides = [1, 1]} : vector<8x32xf32> to vector<8x8xf32>
    %82 = vector.shape_cast %81 : vector<8x8xf32> to vector<1x8x8xf32>
    %83 = tpu.concatenate %76, %78, %80, %82 in 0 : vector<1x8x8xf32>, vector<1x8x8xf32>, vector<1x8x8xf32>, vector<1x8x8xf32> -> vector<4x8x8xf32>
    %84 = arith.truncf %83 : vector<4x8x8xf32> to vector<4x8x8xbf16>
    "tpu.trace_start"() <{level = 10 : i32, message = "hqd,hkd->hqk"}> : () -> ()
    %cst_37 = arith.constant dense<0.000000e+00> : vector<4x8x8xf32>
    %85 = tpu.matmul %64, %74, %cst_37 {dimension_numbers = #tpu.dot_dimension_numbers<[2], [2], [1], [1], [0, 0, 0, 1, 1, 1], [0], [0]>} : vector<4x8x8xbf16>, vector<4x8x8xbf16>, vector<4x8x8xf32> -> vector<4x8x8xf32>
    "tpu.trace_stop"() : () -> ()
    %86 = vector.shape_cast %7 : vector<8x8xi1> to vector<1x8x8xi1>
    %cst_38 = arith.constant -3.40282347E+38 : f32
    %87 = vector.shape_cast %86 : vector<1x8x8xi1> to vector<1x8x8xi1>
    %88 = vector.broadcast %87 : vector<1x8x8xi1> to vector<4x8x8xi1>
    %89 = vector.broadcast %cst_38 : f32 to vector<4x8x8xf32>
    %90 = arith.select %88, %85, %89 : vector<4x8x8xi1>, vector<4x8x8xf32>
    %cst_39 = arith.constant dense<0xFF800000> : vector<4x8xf32>
    %91 = vector.multi_reduction <maximumf>, %90, %cst_39 [2] : vector<4x8x8xf32> to vector<4x8xf32>
    %92 = vector.shape_cast %91 : vector<4x8xf32> to vector<4x8x1xf32>
    %93 = vector.broadcast %92 : vector<4x8x1xf32> to vector<4x8x8xf32>
    %94 = arith.subf %90, %93 : vector<4x8x8xf32>
    %95 = math.exp %94 : vector<4x8x8xf32>
    %cst_40 = arith.constant dense<0.000000e+00> : vector<4x8xf32>
    %96 = vector.multi_reduction <add>, %95, %cst_40 [2] : vector<4x8x8xf32> to vector<4x8xf32>
    %97 = vector.shape_cast %96 : vector<4x8xf32> to vector<4x8x1xf32>
    %98 = tpu.reciprocal %97 {approx = true} : vector<4x8x1xf32> -> vector<4x8x1xf32>
    %99 = vector.broadcast %98 : vector<4x8x1xf32> to vector<4x8x8xf32>
    %100 = arith.mulf %95, %99 : vector<4x8x8xf32>
    %c0_41 = arith.constant 0 : index
    %c0_42 = arith.constant 0 : index
    %c0_43 = arith.constant 0 : index
    %c0_44 = arith.constant 0 : index
    %101 = vector.load %arg32[%c0_41, %c0_42, %c0_43, %c0_44] : memref<1x4x8x8xf32, #tpu.memory_space<vmem>>, vector<1x4x8x8xf32>
    %102 = vector.shape_cast %101 : vector<1x4x8x8xf32> to vector<4x8x8xf32>
    %103 = vector.shape_cast %100 : vector<4x8x8xf32> to vector<1x4x8x8xf32>
    tpu.vector_store %arg32[%c0_41, %c0_42, %c0_43, %c0_44], %103 {strides = array<i32>} : memref<1x4x8x8xf32, #tpu.memory_space<vmem>>, vector<1x4x8x8xf32>,
    %104 = arith.truncf %100 : vector<4x8x8xf32> to vector<4x8x8xbf16>
    "tpu.trace_start"() <{level = 10 : i32, message = "hqk,hkd->hqd"}> : () -> ()
    %cst_45 = arith.constant dense<0.000000e+00> : vector<4x8x8xf32>
    %105 = tpu.matmul %104, %84, %cst_45 {dimension_numbers = #tpu.dot_dimension_numbers<[2], [1], [1], [2], [0, 0, 0, 1, 1, 2], [0], [0]>} : vector<4x8x8xbf16>, vector<4x8x8xbf16>, vector<4x8x8xf32> -> vector<4x8x8xf32>
    "tpu.trace_stop"() : () -> ()
    %106 = vector.extract_strided_slice %105 {offsets = [0, 0, 0], sizes = [1, 8, 8], strides = [1, 1, 1]} : vector<4x8x8xf32> to vector<1x8x8xf32>
    %107 = vector.shape_cast %106 : vector<1x8x8xf32> to vector<8x8xf32>
    %c0_46 = arith.constant 0 : index
    %c0_47 = arith.constant 0 : index
    %108 = vector.load %arg34[%c0_46, %c0_47] : memref<8x32xf32, #tpu.memory_space<vmem>>, vector<8x8xf32>
    tpu.vector_store %arg34[%c0_46, %c0_47], %107 {strides = array<i32>} : memref<8x32xf32, #tpu.memory_space<vmem>>, vector<8x8xf32>,
    %109 = vector.extract_strided_slice %105 {offsets = [1, 0, 0], sizes = [1, 8, 8], strides = [1, 1, 1]} : vector<4x8x8xf32> to vector<1x8x8xf32>
    %110 = vector.shape_cast %109 : vector<1x8x8xf32> to vector<8x8xf32>
    %c0_48 = arith.constant 0 : index
    %c8 = arith.constant 8 : index
    %111 = vector.load %arg34[%c0_48, %c8] : memref<8x32xf32, #tpu.memory_space<vmem>>, vector<8x8xf32>
    tpu.vector_store %arg34[%c0_48, %c8], %110 {strides = array<i32>} : memref<8x32xf32, #tpu.memory_space<vmem>>, vector<8x8xf32>,
    %112 = vector.extract_strided_slice %105 {offsets = [2, 0, 0], sizes = [1, 8, 8], strides = [1, 1, 1]} : vector<4x8x8xf32> to vector<1x8x8xf32>
    %113 = vector.shape_cast %112 : vector<1x8x8xf32> to vector<8x8xf32>
    %c0_49 = arith.constant 0 : index
    %c16 = arith.constant 16 : index
    %114 = vector.load %arg34[%c0_49, %c16] : memref<8x32xf32, #tpu.memory_space<vmem>>, vector<8x8xf32>
    tpu.vector_store %arg34[%c0_49, %c16], %113 {strides = array<i32>} : memref<8x32xf32, #tpu.memory_space<vmem>>, vector<8x8xf32>,
    %115 = vector.extract_strided_slice %105 {offsets = [3, 0, 0], sizes = [1, 8, 8], strides = [1, 1, 1]} : vector<4x8x8xf32> to vector<1x8x8xf32>
    %116 = vector.shape_cast %115 : vector<1x8x8xf32> to vector<8x8xf32>
    %c0_50 = arith.constant 0 : index
    %c24 = arith.constant 24 : index
    %117 = vector.load %arg34[%c0_50, %c24] : memref<8x32xf32, #tpu.memory_space<vmem>>, vector<8x8xf32>
    tpu.vector_store %arg34[%c0_50, %c24], %116 {strides = array<i32>} : memref<8x32xf32, #tpu.memory_space<vmem>>, vector<8x8xf32>,
    %c0_51 = arith.constant 0 : index
    %c0_52 = arith.constant 0 : index
    %118 = vector.load %arg34[%c0_51, %c0_52] : memref<8x32xf32, #tpu.memory_space<vmem>>, vector<8x32xf32>
    %119 = arith.truncf %118 : vector<8x32xf32> to vector<8x32xbf16>
    %c0_53 = arith.constant 0 : index
    %c0_54 = arith.constant 0 : index
    %120 = vector.load %arg17[%c0_53, %c0_54] : memref<32x32xbf16, #tpu.memory_space<vmem>>, vector<32x32xbf16>
    %cst_55 = arith.constant dense<0.000000e+00> : vector<8x32xf32>
    %121 = tpu.matmul %119, %120, %cst_55 {dimension_numbers = #tpu.dot_dimension_numbers<[1], [0], [0], [1], [0, 0, 1, 1], [], []>} : vector<8x32xbf16>, vector<32x32xbf16>, vector<8x32xf32> -> vector<8x32xf32>
    %c0_56 = arith.constant 0 : index
    %c0_57 = arith.constant 0 : index
    %122 = vector.load %arg18[%c0_56, %c0_57] : memref<1x32xf32, #tpu.memory_space<vmem>>, vector<1x32xf32>
    %123 = vector.broadcast %122 : vector<1x32xf32> to vector<8x32xf32>
    %124 = arith.addf %121, %123 : vector<8x32xf32>
    %125 = arith.addf %124, %1 : vector<8x32xf32>
    %c0_58 = arith.constant 0 : index
    %c0_59 = arith.constant 0 : index
    %126 = vector.load %arg7[%c0_58, %c0_59] : memref<1x32xf32, #tpu.memory_space<vmem>>, vector<1x32xf32>
    %c0_60 = arith.constant 0 : index
    %c0_61 = arith.constant 0 : index
    %127 = vector.load %arg8[%c0_60, %c0_61] : memref<1x32xf32, #tpu.memory_space<vmem>>, vector<1x32xf32>
    %cst_62 = arith.constant dense<0.000000e+00> : vector<8xf32>
    %128 = vector.multi_reduction <add>, %125, %cst_62 [1] : vector<8x32xf32> to vector<8xf32>
    %129 = vector.shape_cast %128 : vector<8xf32> to vector<8x1xf32>
    %cst_63 = arith.constant 3.200000e+01 : f32
    %130 = vector.broadcast %cst_63 : f32 to vector<8x1xf32>
    %131 = arith.divf %129, %130 : vector<8x1xf32>
    %132 = vector.broadcast %131 : vector<8x1xf32> to vector<8x32xf32>
    %133 = arith.subf %125, %132 : vector<8x32xf32>
    %134 = arith.mulf %133, %133 : vector<8x32xf32>
    %cst_64 = arith.constant dense<0.000000e+00> : vector<8xf32>
    %135 = vector.multi_reduction <add>, %134, %cst_64 [1] : vector<8x32xf32> to vector<8xf32>
    %136 = vector.shape_cast %135 : vector<8xf32> to vector<8x1xf32>
    %cst_65 = arith.constant 3.200000e+01 : f32
    %137 = vector.broadcast %cst_65 : f32 to vector<8x1xf32>
    %138 = arith.divf %136, %137 : vector<8x1xf32>
    %139 = vector.broadcast %131 : vector<8x1xf32> to vector<8x32xf32>
    %140 = arith.subf %125, %139 : vector<8x32xf32>
    %cst_66 = arith.constant 9.99999996E-13 : f32
    %141 = vector.broadcast %cst_66 : f32 to vector<8x1xf32>
    %142 = arith.addf %138, %141 : vector<8x1xf32>
    %143 = math.rsqrt %142 : vector<8x1xf32>
    %144 = vector.broadcast %143 : vector<8x1xf32> to vector<8x32xf32>
    %145 = arith.mulf %140, %144 : vector<8x32xf32>
    %146 = vector.broadcast %126 : vector<1x32xf32> to vector<8x32xf32>
    %147 = arith.mulf %145, %146 : vector<8x32xf32>
    %148 = vector.broadcast %127 : vector<1x32xf32> to vector<8x32xf32>
    %149 = arith.addf %147, %148 : vector<8x32xf32>
    %150 = arith.truncf %3 : vector<16x32xf32> to vector<16x32xbf16>
    %151 = arith.truncf %149 : vector<8x32xf32> to vector<8x32xbf16>
    %c0_67 = arith.constant 0 : index
    %c0_68 = arith.constant 0 : index
    %152 = vector.load %arg19[%c0_67, %c0_68] : memref<32x32xbf16, #tpu.memory_space<vmem>>, vector<32x32xbf16>
    %cst_69 = arith.constant dense<0.000000e+00> : vector<8x32xf32>
    %153 = tpu.matmul %151, %152, %cst_69 {dimension_numbers = #tpu.dot_dimension_numbers<[1], [0], [0], [1], [0, 0, 1, 1], [], []>} : vector<8x32xbf16>, vector<32x32xbf16>, vector<8x32xf32> -> vector<8x32xf32>
    %c0_70 = arith.constant 0 : index
    %c0_71 = arith.constant 0 : index
    %154 = vector.load %arg20[%c0_70, %c0_71] : memref<1x32xf32, #tpu.memory_space<vmem>>, vector<1x32xf32>
    %155 = vector.broadcast %154 : vector<1x32xf32> to vector<8x32xf32>
    %156 = arith.addf %153, %155 : vector<8x32xf32>
    %c0_72 = arith.constant 0 : index
    %c0_73 = arith.constant 0 : index
    %157 = vector.load %arg21[%c0_72, %c0_73] : memref<32x32xbf16, #tpu.memory_space<vmem>>, vector<32x32xbf16>
    %cst_74 = arith.constant dense<0.000000e+00> : vector<16x32xf32>
    %158 = tpu.matmul %150, %157, %cst_74 {dimension_numbers = #tpu.dot_dimension_numbers<[1], [0], [0], [1], [0, 0, 1, 1], [], []>} : vector<16x32xbf16>, vector<32x32xbf16>, vector<16x32xf32> -> vector<16x32xf32>
    %c0_75 = arith.constant 0 : index
    %c0_76 = arith.constant 0 : index
    %159 = vector.load %arg22[%c0_75, %c0_76] : memref<1x32xf32, #tpu.memory_space<vmem>>, vector<1x32xf32>
    %160 = vector.broadcast %159 : vector<1x32xf32> to vector<16x32xf32>
    %161 = arith.addf %158, %160 : vector<16x32xf32>
    %c0_77 = arith.constant 0 : index
    %c0_78 = arith.constant 0 : index
    %162 = vector.load %arg23[%c0_77, %c0_78] : memref<32x32xbf16, #tpu.memory_space<vmem>>, vector<32x32xbf16>
    %cst_79 = arith.constant dense<0.000000e+00> : vector<16x32xf32>
    %163 = tpu.matmul %150, %162, %cst_79 {dimension_numbers = #tpu.dot_dimension_numbers<[1], [0], [0], [1], [0, 0, 1, 1], [], []>} : vector<16x32xbf16>, vector<32x32xbf16>, vector<16x32xf32> -> vector<16x32xf32>
    %c0_80 = arith.constant 0 : index
    %c0_81 = arith.constant 0 : index
    %164 = vector.load %arg24[%c0_80, %c0_81] : memref<1x32xf32, #tpu.memory_space<vmem>>, vector<1x32xf32>
    %165 = vector.broadcast %164 : vector<1x32xf32> to vector<16x32xf32>
    %166 = arith.addf %163, %165 : vector<16x32xf32>
    %cst_82 = arith.constant 0.353553385 : f32
    %167 = vector.broadcast %cst_82 : f32 to vector<8x32xf32>
    %168 = arith.mulf %156, %167 : vector<8x32xf32>
    %169 = vector.extract_strided_slice %168 {offsets = [0, 0], sizes = [8, 8], strides = [1, 1]} : vector<8x32xf32> to vector<8x8xf32>
    %170 = vector.shape_cast %169 : vector<8x8xf32> to vector<1x8x8xf32>
    %171 = vector.extract_strided_slice %168 {offsets = [0, 8], sizes = [8, 8], strides = [1, 1]} : vector<8x32xf32> to vector<8x8xf32>
    %172 = vector.shape_cast %171 : vector<8x8xf32> to vector<1x8x8xf32>
    %173 = vector.extract_strided_slice %168 {offsets = [0, 16], sizes = [8, 8], strides = [1, 1]} : vector<8x32xf32> to vector<8x8xf32>
    %174 = vector.shape_cast %173 : vector<8x8xf32> to vector<1x8x8xf32>
    %175 = vector.extract_strided_slice %168 {offsets = [0, 24], sizes = [8, 8], strides = [1, 1]} : vector<8x32xf32> to vector<8x8xf32>
    %176 = vector.shape_cast %175 : vector<8x8xf32> to vector<1x8x8xf32>
    %177 = tpu.concatenate %170, %172, %174, %176 in 0 : vector<1x8x8xf32>, vector<1x8x8xf32>, vector<1x8x8xf32>, vector<1x8x8xf32> -> vector<4x8x8xf32>
    %178 = arith.truncf %177 : vector<4x8x8xf32> to vector<4x8x8xbf16>
    %179 = vector.extract_strided_slice %161 {offsets = [0, 0], sizes = [16, 8], strides = [1, 1]} : vector<16x32xf32> to vector<16x8xf32>
    %180 = vector.shape_cast %179 : vector<16x8xf32> to vector<1x16x8xf32>
    %181 = vector.extract_strided_slice %161 {offsets = [0, 8], sizes = [16, 8], strides = [1, 1]} : vector<16x32xf32> to vector<16x8xf32>
    %182 = vector.shape_cast %181 : vector<16x8xf32> to vector<1x16x8xf32>
    %183 = vector.extract_strided_slice %161 {offsets = [0, 16], sizes = [16, 8], strides = [1, 1]} : vector<16x32xf32> to vector<16x8xf32>
    %184 = vector.shape_cast %183 : vector<16x8xf32> to vector<1x16x8xf32>
    %185 = vector.extract_strided_slice %161 {offsets = [0, 24], sizes = [16, 8], strides = [1, 1]} : vector<16x32xf32> to vector<16x8xf32>
    %186 = vector.shape_cast %185 : vector<16x8xf32> to vector<1x16x8xf32>
    %187 = tpu.concatenate %180, %182, %184, %186 in 0 : vector<1x16x8xf32>, vector<1x16x8xf32>, vector<1x16x8xf32>, vector<1x16x8xf32> -> vector<4x16x8xf32>
    %188 = arith.truncf %187 : vector<4x16x8xf32> to vector<4x16x8xbf16>
    %189 = vector.extract_strided_slice %166 {offsets = [0, 0], sizes = [16, 8], strides = [1, 1]} : vector<16x32xf32> to vector<16x8xf32>
    %190 = vector.shape_cast %189 : vector<16x8xf32> to vector<1x16x8xf32>
    %191 = vector.extract_strided_slice %166 {offsets = [0, 8], sizes = [16, 8], strides = [1, 1]} : vector<16x32xf32> to vector<16x8xf32>
    %192 = vector.shape_cast %191 : vector<16x8xf32> to vector<1x16x8xf32>
    %193 = vector.extract_strided_slice %166 {offsets = [0, 16], sizes = [16, 8], strides = [1, 1]} : vector<16x32xf32> to vector<16x8xf32>
    %194 = vector.shape_cast %193 : vector<16x8xf32> to vector<1x16x8xf32>
    %195 = vector.extract_strided_slice %166 {offsets = [0, 24], sizes = [16, 8], strides = [1, 1]} : vector<16x32xf32> to vector<16x8xf32>
    %196 = vector.shape_cast %195 : vector<16x8xf32> to vector<1x16x8xf32>
    %197 = tpu.concatenate %190, %192, %194, %196 in 0 : vector<1x16x8xf32>, vector<1x16x8xf32>, vector<1x16x8xf32>, vector<1x16x8xf32> -> vector<4x16x8xf32>
    %198 = arith.truncf %197 : vector<4x16x8xf32> to vector<4x16x8xbf16>
    "tpu.trace_start"() <{level = 10 : i32, message = "hqd,hkd->hqk"}> : () -> ()
    %cst_83 = arith.constant dense<0.000000e+00> : vector<4x8x16xf32>
    %199 = tpu.matmul %178, %188, %cst_83 {dimension_numbers = #tpu.dot_dimension_numbers<[2], [2], [1], [1], [0, 0, 0, 1, 1, 1], [0], [0]>} : vector<4x8x8xbf16>, vector<4x16x8xbf16>, vector<4x8x16xf32> -> vector<4x8x16xf32>
    "tpu.trace_stop"() : () -> ()
    %200 = vector.shape_cast %11 : vector<8x16xi1> to vector<1x8x16xi1>
    %cst_84 = arith.constant -3.40282347E+38 : f32
    %201 = vector.shape_cast %200 : vector<1x8x16xi1> to vector<1x8x16xi1>
    %202 = vector.broadcast %201 : vector<1x8x16xi1> to vector<4x8x16xi1>
    %203 = vector.broadcast %cst_84 : f32 to vector<4x8x16xf32>
    %204 = arith.select %202, %199, %203 : vector<4x8x16xi1>, vector<4x8x16xf32>
    %cst_85 = arith.constant dense<0xFF800000> : vector<4x8xf32>
    %205 = vector.multi_reduction <maximumf>, %204, %cst_85 [2] : vector<4x8x16xf32> to vector<4x8xf32>
    %206 = vector.shape_cast %205 : vector<4x8xf32> to vector<4x8x1xf32>
    %207 = vector.broadcast %206 : vector<4x8x1xf32> to vector<4x8x16xf32>
    %208 = arith.subf %204, %207 : vector<4x8x16xf32>
    %209 = math.exp %208 : vector<4x8x16xf32>
    %cst_86 = arith.constant dense<0.000000e+00> : vector<4x8xf32>
    %210 = vector.multi_reduction <add>, %209, %cst_86 [2] : vector<4x8x16xf32> to vector<4x8xf32>
    %211 = vector.shape_cast %210 : vector<4x8xf32> to vector<4x8x1xf32>
    %212 = tpu.reciprocal %211 {approx = true} : vector<4x8x1xf32> -> vector<4x8x1xf32>
    %213 = vector.broadcast %212 : vector<4x8x1xf32> to vector<4x8x16xf32>
    %214 = arith.mulf %209, %213 : vector<4x8x16xf32>
    %c0_87 = arith.constant 0 : index
    %c0_88 = arith.constant 0 : index
    %c0_89 = arith.constant 0 : index
    %c0_90 = arith.constant 0 : index
    %215 = vector.load %arg33[%c0_87, %c0_88, %c0_89, %c0_90] : memref<1x4x8x16xf32, #tpu.memory_space<vmem>>, vector<1x4x8x16xf32>
    %216 = vector.shape_cast %215 : vector<1x4x8x16xf32> to vector<4x8x16xf32>
    %217 = vector.shape_cast %214 : vector<4x8x16xf32> to vector<1x4x8x16xf32>
    tpu.vector_store %arg33[%c0_87, %c0_88, %c0_89, %c0_90], %217 {strides = array<i32>} : memref<1x4x8x16xf32, #tpu.memory_space<vmem>>, vector<1x4x8x16xf32>,
    %218 = arith.truncf %214 : vector<4x8x16xf32> to vector<4x8x16xbf16>
    "tpu.trace_start"() <{level = 10 : i32, message = "hqk,hkd->hqd"}> : () -> ()
    %cst_91 = arith.constant dense<0.000000e+00> : vector<4x8x8xf32>
    %219 = tpu.matmul %218, %198, %cst_91 {dimension_numbers = #tpu.dot_dimension_numbers<[2], [1], [1], [2], [0, 0, 0, 1, 1, 2], [0], [0]>} : vector<4x8x16xbf16>, vector<4x16x8xbf16>, vector<4x8x8xf32> -> vector<4x8x8xf32>
    "tpu.trace_stop"() : () -> ()
    %220 = vector.extract_strided_slice %219 {offsets = [0, 0, 0], sizes = [1, 8, 8], strides = [1, 1, 1]} : vector<4x8x8xf32> to vector<1x8x8xf32>
    %221 = vector.shape_cast %220 : vector<1x8x8xf32> to vector<8x8xf32>
    %c0_92 = arith.constant 0 : index
    %c0_93 = arith.constant 0 : index
    %222 = vector.load %arg34[%c0_92, %c0_93] : memref<8x32xf32, #tpu.memory_space<vmem>>, vector<8x8xf32>
    tpu.vector_store %arg34[%c0_92, %c0_93], %221 {strides = array<i32>} : memref<8x32xf32, #tpu.memory_space<vmem>>, vector<8x8xf32>,
    %223 = vector.extract_strided_slice %219 {offsets = [1, 0, 0], sizes = [1, 8, 8], strides = [1, 1, 1]} : vector<4x8x8xf32> to vector<1x8x8xf32>
    %224 = vector.shape_cast %223 : vector<1x8x8xf32> to vector<8x8xf32>
    %c0_94 = arith.constant 0 : index
    %c8_95 = arith.constant 8 : index
    %225 = vector.load %arg34[%c0_94, %c8_95] : memref<8x32xf32, #tpu.memory_space<vmem>>, vector<8x8xf32>
    tpu.vector_store %arg34[%c0_94, %c8_95], %224 {strides = array<i32>} : memref<8x32xf32, #tpu.memory_space<vmem>>, vector<8x8xf32>,
    %226 = vector.extract_strided_slice %219 {offsets = [2, 0, 0], sizes = [1, 8, 8], strides = [1, 1, 1]} : vector<4x8x8xf32> to vector<1x8x8xf32>
    %227 = vector.shape_cast %226 : vector<1x8x8xf32> to vector<8x8xf32>
    %c0_96 = arith.constant 0 : index
    %c16_97 = arith.constant 16 : index
    %228 = vector.load %arg34[%c0_96, %c16_97] : memref<8x32xf32, #tpu.memory_space<vmem>>, vector<8x8xf32>
    tpu.vector_store %arg34[%c0_96, %c16_97], %227 {strides = array<i32>} : memref<8x32xf32, #tpu.memory_space<vmem>>, vector<8x8xf32>,
    %229 = vector.extract_strided_slice %219 {offsets = [3, 0, 0], sizes = [1, 8, 8], strides = [1, 1, 1]} : vector<4x8x8xf32> to vector<1x8x8xf32>
    %230 = vector.shape_cast %229 : vector<1x8x8xf32> to vector<8x8xf32>
    %c0_98 = arith.constant 0 : index
    %c24_99 = arith.constant 24 : index
    %231 = vector.load %arg34[%c0_98, %c24_99] : memref<8x32xf32, #tpu.memory_space<vmem>>, vector<8x8xf32>
    tpu.vector_store %arg34[%c0_98, %c24_99], %230 {strides = array<i32>} : memref<8x32xf32, #tpu.memory_space<vmem>>, vector<8x8xf32>,
    %c0_100 = arith.constant 0 : index
    %c0_101 = arith.constant 0 : index
    %232 = vector.load %arg34[%c0_100, %c0_101] : memref<8x32xf32, #tpu.memory_space<vmem>>, vector<8x32xf32>
    %233 = arith.truncf %232 : vector<8x32xf32> to vector<8x32xbf16>
    %c0_102 = arith.constant 0 : index
    %c0_103 = arith.constant 0 : index
    %234 = vector.load %arg25[%c0_102, %c0_103] : memref<32x32xbf16, #tpu.memory_space<vmem>>, vector<32x32xbf16>
    %cst_104 = arith.constant dense<0.000000e+00> : vector<8x32xf32>
    %235 = tpu.matmul %233, %234, %cst_104 {dimension_numbers = #tpu.dot_dimension_numbers<[1], [0], [0], [1], [0, 0, 1, 1], [], []>} : vector<8x32xbf16>, vector<32x32xbf16>, vector<8x32xf32> -> vector<8x32xf32>
    %c0_105 = arith.constant 0 : index
    %c0_106 = arith.constant 0 : index
    %236 = vector.load %arg26[%c0_105, %c0_106] : memref<1x32xf32, #tpu.memory_space<vmem>>, vector<1x32xf32>
    %237 = vector.broadcast %236 : vector<1x32xf32> to vector<8x32xf32>
    %238 = arith.addf %235, %237 : vector<8x32xf32>
    %239 = arith.addf %238, %125 : vector<8x32xf32>
    %c0_107 = arith.constant 0 : index
    %c0_108 = arith.constant 0 : index
    %240 = vector.load %arg9[%c0_107, %c0_108] : memref<1x32xf32, #tpu.memory_space<vmem>>, vector<1x32xf32>
    %c0_109 = arith.constant 0 : index
    %c0_110 = arith.constant 0 : index
    %241 = vector.load %arg10[%c0_109, %c0_110] : memref<1x32xf32, #tpu.memory_space<vmem>>, vector<1x32xf32>
    %cst_111 = arith.constant dense<0.000000e+00> : vector<8xf32>
    %242 = vector.multi_reduction <add>, %239, %cst_111 [1] : vector<8x32xf32> to vector<8xf32>
    %243 = vector.shape_cast %242 : vector<8xf32> to vector<8x1xf32>
    %cst_112 = arith.constant 3.200000e+01 : f32
    %244 = vector.broadcast %cst_112 : f32 to vector<8x1xf32>
    %245 = arith.divf %243, %244 : vector<8x1xf32>
    %246 = vector.broadcast %245 : vector<8x1xf32> to vector<8x32xf32>
    %247 = arith.subf %239, %246 : vector<8x32xf32>
    %248 = arith.mulf %247, %247 : vector<8x32xf32>
    %cst_113 = arith.constant dense<0.000000e+00> : vector<8xf32>
    %249 = vector.multi_reduction <add>, %248, %cst_113 [1] : vector<8x32xf32> to vector<8xf32>
    %250 = vector.shape_cast %249 : vector<8xf32> to vector<8x1xf32>
    %cst_114 = arith.constant 3.200000e+01 : f32
    %251 = vector.broadcast %cst_114 : f32 to vector<8x1xf32>
    %252 = arith.divf %250, %251 : vector<8x1xf32>
    %253 = vector.broadcast %245 : vector<8x1xf32> to vector<8x32xf32>
    %254 = arith.subf %239, %253 : vector<8x32xf32>
    %cst_115 = arith.constant 9.99999996E-13 : f32
    %255 = vector.broadcast %cst_115 : f32 to vector<8x1xf32>
    %256 = arith.addf %252, %255 : vector<8x1xf32>
    %257 = math.rsqrt %256 : vector<8x1xf32>
    %258 = vector.broadcast %257 : vector<8x1xf32> to vector<8x32xf32>
    %259 = arith.mulf %254, %258 : vector<8x32xf32>
    %260 = vector.broadcast %240 : vector<1x32xf32> to vector<8x32xf32>
    %261 = arith.mulf %259, %260 : vector<8x32xf32>
    %262 = vector.broadcast %241 : vector<1x32xf32> to vector<8x32xf32>
    %263 = arith.addf %261, %262 : vector<8x32xf32>
    %264 = arith.truncf %263 : vector<8x32xf32> to vector<8x32xbf16>
    %c0_116 = arith.constant 0 : index
    %c0_117 = arith.constant 0 : index
    %265 = vector.load %arg27[%c0_116, %c0_117] : memref<32x64xbf16, #tpu.memory_space<vmem>>, vector<32x64xbf16>
    %cst_118 = arith.constant dense<0.000000e+00> : vector<8x64xf32>
    %266 = tpu.matmul %264, %265, %cst_118 {dimension_numbers = #tpu.dot_dimension_numbers<[1], [0], [0], [1], [0, 0, 1, 1], [], []>} : vector<8x32xbf16>, vector<32x64xbf16>, vector<8x64xf32> -> vector<8x64xf32>
    %c0_119 = arith.constant 0 : index
    %c0_120 = arith.constant 0 : index
    %267 = vector.load %arg28[%c0_119, %c0_120] : memref<1x64xf32, #tpu.memory_space<vmem>>, vector<1x64xf32>
    %268 = vector.broadcast %267 : vector<1x64xf32> to vector<8x64xf32>
    %269 = arith.addf %266, %268 : vector<8x64xf32>
    %cst_121 = arith.constant 0.000000e+00 : f32
    %270 = vector.broadcast %cst_121 : f32 to vector<8x64xf32>
    %271 = arith.maximumf %269, %270 : vector<8x64xf32>
    %272 = arith.truncf %271 : vector<8x64xf32> to vector<8x64xbf16>
    %c0_122 = arith.constant 0 : index
    %c0_123 = arith.constant 0 : index
    %273 = vector.load %arg29[%c0_122, %c0_123] : memref<64x32xbf16, #tpu.memory_space<vmem>>, vector<64x32xbf16>
    %cst_124 = arith.constant dense<0.000000e+00> : vector<8x32xf32>
    %274 = tpu.matmul %272, %273, %cst_124 {dimension_numbers = #tpu.dot_dimension_numbers<[1], [0], [0], [1], [0, 0, 1, 1], [], []>} : vector<8x64xbf16>, vector<64x32xbf16>, vector<8x32xf32> -> vector<8x32xf32>
    %c0_125 = arith.constant 0 : index
    %c0_126 = arith.constant 0 : index
    %275 = vector.load %arg30[%c0_125, %c0_126] : memref<1x32xf32, #tpu.memory_space<vmem>>, vector<1x32xf32>
    %276 = vector.broadcast %275 : vector<1x32xf32> to vector<8x32xf32>
    %277 = arith.addf %274, %276 : vector<8x32xf32>
    %278 = arith.addf %277, %239 : vector<8x32xf32>
    %c0_127 = arith.constant 0 : index
    %c0_128 = arith.constant 0 : index
    %c0_129 = arith.constant 0 : index
    %279 = vector.load %arg31[%c0_127, %c0_128, %c0_129] : memref<1x8x32xf32, #tpu.memory_space<vmem>>, vector<1x8x32xf32>
    %280 = vector.shape_cast %279 : vector<1x8x32xf32> to vector<8x32xf32>
    %281 = vector.shape_cast %278 : vector<8x32xf32> to vector<1x8x32xf32>
    tpu.vector_store %arg31[%c0_127, %c0_128, %c0_129], %281 {strides = array<i32>} : memref<1x8x32xf32, #tpu.memory_space<vmem>>, vector<1x8x32xf32>,
    return
  }
  func.func @transform_0(%arg0: i32) -> (i32, i32, i32) {
    %c0_i32 = arith.constant 0 : i32
    %c0_i32_0 = arith.constant 0 : i32
    %c0_i32_1 = arith.constant 0 : i32
    return %arg0, %c0_i32, %c0_i32_0 : i32, i32, i32
  }
  func.func @transform_1(%arg0: i32) -> (i32, i32, i32) {
    %c0_i32 = arith.constant 0 : i32
    %c0_i32_0 = arith.constant 0 : i32
    %c0_i32_1 = arith.constant 0 : i32
    return %arg0, %c0_i32, %c0_i32_0 : i32, i32, i32
  }
  func.func @transform_2(%arg0: i32) -> (i32, i32, i32) {
    %c0_i32 = arith.constant 0 : i32
    %c0_i32_0 = arith.constant 0 : i32
    %c0_i32_1 = arith.constant 0 : i32
    return %arg0, %c0_i32, %c0_i32_0 : i32, i32, i32
  }
  func.func @transform_3(%arg0: i32) -> (i32, i32, i32) {
    %c0_i32 = arith.constant 0 : i32
    %c0_i32_0 = arith.constant 0 : i32
    %c0_i32_1 = arith.constant 0 : i32
    return %arg0, %c0_i32, %c0_i32_0 : i32, i32, i32
  }
  func.func @transform_4(%arg0: i32) -> (i32, i32) {
    %c0_i32 = arith.constant 0 : i32
    %c0_i32_0 = arith.constant 0 : i32
    %c0_i32_1 = arith.constant 0 : i32
    return %c0_i32, %c0_i32_0 : i32, i32
  }
  func.func @transform_5(%arg0: i32) -> (i32, i32) {
    %c0_i32 = arith.constant 0 : i32
    %c0_i32_0 = arith.constant 0 : i32
    %c0_i32_1 = arith.constant 0 : i32
    return %c0_i32, %c0_i32_0 : i32, i32
  }
  func.func @transform_6(%arg0: i32) -> (i32, i32) {
    %c0_i32 = arith.constant 0 : i32
    %c0_i32_0 = arith.constant 0 : i32
    %c0_i32_1 = arith.constant 0 : i32
    return %c0_i32, %c0_i32_0 : i32, i32
  }
  func.func @transform_7(%arg0: i32) -> (i32, i32) {
    %c0_i32 = arith.constant 0 : i32
    %c0_i32_0 = arith.constant 0 : i32
    %c0_i32_1 = arith.constant 0 : i32
    return %c0_i32, %c0_i32_0 : i32, i32
  }
  func.func @transform_8(%arg0: i32) -> (i32, i32) {
    %c0_i32 = arith.constant 0 : i32
    %c0_i32_0 = arith.constant 0 : i32
    %c0_i32_1 = arith.constant 0 : i32
    return %c0_i32, %c0_i32_0 : i32, i32
  }
  func.func @transform_9(%arg0: i32) -> (i32, i32) {
    %c0_i32 = arith.constant 0 : i32
    %c0_i32_0 = arith.constant 0 : i32
    %c0_i32_1 = arith.constant 0 : i32
    return %c0_i32, %c0_i32_0 : i32, i32
  }
  func.func @transform_10(%arg0: i32) -> (i32, i32) {
    %c0_i32 = arith.constant 0 : i32
    %c0_i32_0 = arith.constant 0 : i32
    %c0_i32_1 = arith.constant 0 : i32
    return %c0_i32, %c0_i32_0 : i32, i32
  }
  func.func @transform_11(%arg0: i32) -> (i32, i32) {
    %c0_i32 = arith.constant 0 : i32
    %c0_i32_0 = arith.constant 0 : i32
    %c0_i32_1 = arith.constant 0 : i32
    return %c0_i32, %c0_i32_0 : i32, i32
  }
  func.func @transform_12(%arg0: i32) -> (i32, i32) {
    %c0_i32 = arith.constant 0 : i32
    %c0_i32_0 = arith.constant 0 : i32
    %c0_i32_1 = arith.constant 0 : i32
    return %c0_i32, %c0_i32_0 : i32, i32
  }
  func.func @transform_13(%arg0: i32) -> (i32, i32) {
    %c0_i32 = arith.constant 0 : i32
    %c0_i32_0 = arith.constant 0 : i32
    %c0_i32_1 = arith.constant 0 : i32
    return %c0_i32, %c0_i32_0 : i32, i32
  }
  func.func @transform_14(%arg0: i32) -> (i32, i32) {
    %c0_i32 = arith.constant 0 : i32
    %c0_i32_0 = arith.constant 0 : i32
    %c0_i32_1 = arith.constant 0 : i32
    return %c0_i32, %c0_i32_0 : i32, i32
  }
  func.func @transform_15(%arg0: i32) -> (i32, i32) {
    %c0_i32 = arith.constant 0 : i32
    %c0_i32_0 = arith.constant 0 : i32
    %c0_i32_1 = arith.constant 0 : i32
    return %c0_i32, %c0_i32_0 : i32, i32
  }
  func.func @transform_16(%arg0: i32) -> (i32, i32) {
    %c0_i32 = arith.constant 0 : i32
    %c0_i32_0 = arith.constant 0 : i32
    %c0_i32_1 = arith.constant 0 : i32
    return %c0_i32, %c0_i32_0 : i32, i32
  }
  func.func @transform_17(%arg0: i32) -> (i32, i32) {
    %c0_i32 = arith.constant 0 : i32
    %c0_i32_0 = arith.constant 0 : i32
    %c0_i32_1 = arith.constant 0 : i32
    return %c0_i32, %c0_i32_0 : i32, i32
  }
  func.func @transform_18(%arg0: i32) -> (i32, i32) {
    %c0_i32 = arith.constant 0 : i32
    %c0_i32_0 = arith.constant 0 : i32
    %c0_i32_1 = arith.constant 0 : i32
    return %c0_i32, %c0_i32_0 : i32, i32
  }
  func.func @transform_19(%arg0: i32) -> (i32, i32) {
    %c0_i32 = arith.constant 0 : i32
    %c0_i32_0 = arith.constant 0 : i32
    %c0_i32_1 = arith.constant 0 : i32
    return %c0_i32, %c0_i32_0 : i32, i32
  }
  func.func @transform_20(%arg0: i32) -> (i32, i32) {
    %c0_i32 = arith.constant 0 : i32
    %c0_i32_0 = arith.constant 0 : i32
    %c0_i32_1 = arith.constant 0 : i32
    return %c0_i32, %c0_i32_0 : i32, i32
  }
  func.func @transform_21(%arg0: i32) -> (i32, i32) {
    %c0_i32 = arith.constant 0 : i32
    %c0_i32_0 = arith.constant 0 : i32
    %c0_i32_1 = arith.constant 0 : i32
    return %c0_i32, %c0_i32_0 : i32, i32
  }
  func.func @transform_22(%arg0: i32) -> (i32, i32) {
    %c0_i32 = arith.constant 0 : i32
    %c0_i32_0 = arith.constant 0 : i32
    %c0_i32_1 = arith.constant 0 : i32
    return %c0_i32, %c0_i32_0 : i32, i32
  }
  func.func @transform_23(%arg0: i32) -> (i32, i32) {
    %c0_i32 = arith.constant 0 : i32
    %c0_i32_0 = arith.constant 0 : i32
    %c0_i32_1 = arith.constant 0 : i32
    return %c0_i32, %c0_i32_0 : i32, i32
  }
  func.func @transform_24(%arg0: i32) -> (i32, i32) {
    %c0_i32 = arith.constant 0 : i32
    %c0_i32_0 = arith.constant 0 : i32
    %c0_i32_1 = arith.constant 0 : i32
    return %c0_i32, %c0_i32_0 : i32, i32
  }
  func.func @transform_25(%arg0: i32) -> (i32, i32) {
    %c0_i32 = arith.constant 0 : i32
    %c0_i32_0 = arith.constant 0 : i32
    %c0_i32_1 = arith.constant 0 : i32
    return %c0_i32, %c0_i32_0 : i32, i32
  }
  func.func @transform_26(%arg0: i32) -> (i32, i32) {
    %c0_i32 = arith.constant 0 : i32
    %c0_i32_0 = arith.constant 0 : i32
    %c0_i32_1 = arith.constant 0 : i32
    return %c0_i32, %c0_i32_0 : i32, i32
  }
  func.func @transform_27(%arg0: i32) -> (i32, i32) {
    %c0_i32 = arith.constant 0 : i32
    %c0_i32_0 = arith.constant 0 : i32
    %c0_i32_1 = arith.constant 0 : i32
    return %c0_i32, %c0_i32_0 : i32, i32
  }
  func.func @transform_28(%arg0: i32) -> (i32, i32) {
    %c0_i32 = arith.constant 0 : i32
    %c0_i32_0 = arith.constant 0 : i32
    %c0_i32_1 = arith.constant 0 : i32
    return %c0_i32, %c0_i32_0 : i32, i32
  }
  func.func @transform_29(%arg0: i32) -> (i32, i32) {
    %c0_i32 = arith.constant 0 : i32
    %c0_i32_0 = arith.constant 0 : i32
    %c0_i32_1 = arith.constant 0 : i32
    return %c0_i32, %c0_i32_0 : i32, i32
  }
  func.func @transform_30(%arg0: i32) -> (i32, i32, i32) {
    %c0_i32 = arith.constant 0 : i32
    %c0_i32_0 = arith.constant 0 : i32
    %c0_i32_1 = arith.constant 0 : i32
    return %arg0, %c0_i32, %c0_i32_0 : i32, i32, i32
  }
  func.func @transform_31(%arg0: i32) -> (i32, i32, i32, i32) {
    %c0_i32 = arith.constant 0 : i32
    %c0_i32_0 = arith.constant 0 : i32
    %c0_i32_1 = arith.constant 0 : i32
    %c0_i32_2 = arith.constant 0 : i32
    return %arg0, %c0_i32, %c0_i32_0, %c0_i32_1 : i32, i32, i32, i32
  }
  func.func @transform_32(%arg0: i32) -> (i32, i32, i32, i32) {
    %c0_i32 = arith.constant 0 : i32
    %c0_i32_0 = arith.constant 0 : i32
    %c0_i32_1 = arith.constant 0 : i32
    %c0_i32_2 = arith.constant 0 : i32
    return %arg0, %c0_i32, %c0_i32_0, %c0_i32_1 : i32, i32, i32, i32
  }
}

</mosaic_0001>

<bundles_post_ra>
// kernel: tpu_custom_call.1
= control target key start
LH: loop header
LB: loop body
LE: loop exit
PB: predicated region body
PF: predicated region fallthrough
CT: control target
= control target key end

     0   :  { %s4975_s6 = smov 1   ;;  %s4976_s10 = smov 2   ;;  %s5913_s0 = inlined_call_operand.smem [shape: u32[33], index: -1, kind: input, shape index: {}] }
   0x1   :  { %s5049_s5 = sld [smem:[%s5913_s0]]   ;;  %s4977_s14 = smov 3  }
   0x2   :  { %s5054_s9 = sld [smem:[%s5913_s0 + %s4975_s6]]   ;;  %s4978_s18 = smov 4  }
   0x3   :  { %s5059_s13 = sld [smem:[%s5913_s0 + %s4976_s10]]   ;;  %s4979_s22 = smov 5  }
   0x4   :  { %s5064_s17 = sld [smem:[%s5913_s0 + %s4977_s14]]   ;;  %s4980_s26 = smov 6  }
   0x5   :  { %s5069_s21 = sld [smem:[%s5913_s0 + %s4978_s18]]   ;;  %s4981_s30 = smov 7  }
   0x6   :  { %s5074_s25 = sld [smem:[%s5913_s0 + %s4979_s22]]   ;;  %s4982_s4 = smov 8  }
   0x7   :  { %5937 = sst [smem:[#allocation53_spill]] %s5049_s5  ;;  %s4983_s10 = smov 9  }
   0x8   :  { %5938 = sst [smem:[#allocation54_spill]] %s5054_s9  ;;  %s4984_s15 = smov 10  }
   0x9   :  { %5939 = sst [smem:[#allocation55_spill]] %s5059_s13  ;;  %s4985_s20 = smov 11  }
   0xa   :  { %5940 = sst [smem:[#allocation56_spill]] %s5064_s17  ;;  %s4987_s1 = smov 13  }
   0xb   :  { %5941 = sst [smem:[#allocation57_spill]] %s5069_s21  ;;  %s4988_s7 = smov 14  }
   0xc   :  { %s5079_s29 = sld [smem:[%s5913_s0 + %s4980_s26]]   ;;  %s4986_s26 = smov 12  }
   0xd   :  { %s5084_s3 = sld [smem:[%s5913_s0 + %s4981_s30]]   ;;  %s4990_s22 = smov 16  }
   0xe   :  { %s5089_s8 = sld [smem:[%s5913_s0 + %s4982_s4]]   ;;  %s4991_s28 = smov 17  }
   0xf   :  { %s5094_s14 = sld [smem:[%s5913_s0 + %s4983_s10]]  }
  0x10   :  { %s5099_s19 = sld [smem:[%s5913_s0 + %s4984_s15]]   ;;  %s4989_s15 = smov 15  }
  0x11   :  { %s5104_s24 = sld [smem:[%s5913_s0 + %s4985_s20]]  }
  0x12   :  { %s5109_s30 = sld [smem:[%s5913_s0 + %s4986_s26]]  }
  0x13   :  { %5942 = sst [smem:[#allocation58_spill]] %s5084_s3 }
  0x14   :  { %5943 = sst [smem:[#allocation59_spill]] %s5089_s8 }
  0x15   :  { %5944 = sst [smem:[#allocation60_spill]] %s5094_s14 }
  0x16   :  { %5945 = sst [smem:[#allocation61_spill]] %s5099_s19 }
  0x17   :  { %s5114_s6 = sld [smem:[%s5913_s0 + %s4987_s1]]  }
  0x18   :  { %s5119_s12 = sld [smem:[%s5913_s0 + %s4988_s7]]   ;;  %s4992_s7 = smov 18  }
  0x19   :  { %s5124_s20 = sld [smem:[%s5913_s0 + %s4989_s15]]   ;;  %s4993_s15 = smov 19  }
  0x1a   :  { %s5129_s27 = sld [smem:[%s5913_s0 + %s4990_s22]]   ;;  %s4994_s22 = smov 20  }
  0x1b   :  { %s5134_s4 = sld [smem:[%s5913_s0 + %s4991_s28]]   ;;  %s4995_s28 = smov 21  }
  0x1c   :  { %s5139_s9 = sld [smem:[%s5913_s0 + %s4992_s7]]   ;;  %s4996_s7 = smov 22  }
  0x1d   :  { %5946 = sst [smem:[#allocation62_spill]] %s5114_s6 }
  0x1e   :  { %5947 = sst [smem:[#allocation63_spill]] %s5119_s12 }
  0x1f   :  { %5948 = sst [smem:[#allocation64_spill]] %s5124_s20 }
  0x20   :  { %s5144_s19 = sld [smem:[%s5913_s0 + %s4993_s15]]   ;;  %s4997_s15 = smov 23  }
  0x21   :  { %5949 = sst [smem:[#allocation65_spill]] %s5134_s4 }
  0x22   :  { %5950 = sst [smem:[#allocation66_spill]] %s5139_s9 }
  0x23   :  { %s5149_s5 = sld [smem:[%s5913_s0 + %s4994_s22]]   ;;  %s4998_s22 = smov 24  }
  0x24   :  { %s5154_s17 = sld [smem:[%s5913_s0 + %s4995_s28]]   ;;  %s4999_s28 = smov 25  }
  0x25   :  { %s5159_s13 = sld [smem:[%s5913_s0 + %s4996_s7]]   ;;  %s5000_s7 = smov 26  }
  0x26   :  { %5951 = sst [smem:[#allocation67_spill]] %s5144_s19 }
  0x27   :  { %s5164_s19 = sld [smem:[%s5913_s0 + %s4997_s15]]   ;;  %s5001_s15 = smov 27  }
  0x28   :  { %s5179_s4 = sld [smem:[%s5913_s0 + %s5000_s7]]   ;;  %s5004_s7 = smov 30  }
  0x29   :  { %5952 = sst [smem:[#allocation68_spill]] %s5149_s5 }
  0x2a   :  { %5953 = sst [smem:[#allocation69_spill]] %s5154_s17 }
  0x2b   :  { %5954 = sst [smem:[#allocation70_spill]] %s5159_s13 }
  0x2c   :  { %s5169_s5 = sld [smem:[%s5913_s0 + %s4998_s22]]   ;;  %s5002_s22 = smov 28  }
  0x2d   :  { %5955 = sst [smem:[#allocation71_spill]] %s5164_s19 }
  0x2e   :  { %s5174_s17 = sld [smem:[%s5913_s0 + %s4999_s28]]   ;;  %s5003_s28 = smov 29  }
  0x2f   :  { %5958 = sst [smem:[#allocation74_spill]] %s5179_s4 }
  0x30   :  { %s5184_s19 = sld [smem:[%s5913_s0 + %s5001_s15]]   ;;  %s5005_s15 = smov 31  }
  0x31   :  { %s5199_s4 = sld [smem:[%s5913_s0 + %s5004_s7]]  }
  0x32   :  { %5956 = sst [smem:[#allocation72_spill]] %s5169_s5 }
  0x33   :  { %s5189_s5 = sld [smem:[%s5913_s0 + %s5002_s22]]   ;;  %s5006_s22 = smov 32  }
  0x34   :  { %5957 = sst [smem:[#allocation73_spill]] %s5174_s17 }
  0x35   :  { %s5194_s17 = sld [smem:[%s5913_s0 + %s5003_s28]]  }
  0x36   :  { %5959 = sst [smem:[#allocation75_spill]] %s5184_s19 }
  0x37   :  { %5962 = sst [smem:[#allocation78_spill]] %s5199_s4 }
  0x38   :  { %s5204_s19 = sld [smem:[%s5913_s0 + %s5005_s15]]  }
  0x39   :  { %5960 = sst [smem:[#allocation76_spill]] %s5189_s5 }
  0x3a   :  { %s5209_s5 = sld [smem:[%s5913_s0 + %s5006_s22]]  }
  0x3b   :  { %5961 = sst [smem:[#allocation77_spill]] %s5194_s17 }
  0x40   :  { %5963 = sst [smem:[#allocation79_spill]] %s5209_s5 }
  0x41   :  { %71 = vsyncpa [#allocation4], 0 }
  0x42   :  { %73 = vsyncpa [#allocation4 + $0x1], 0 }
  0x43   :  { %74 = vsyncpa [#allocation7], 0 }
  0x44   :  { %76 = vsyncpa [#allocation7 + $0x1], 0 }
  0x45   :  { %77 = vsyncpa [#allocation10], 0 }
  0x46   :  { %78 = vsyncpa [#allocation13], 0 }
  0x47   :  { %79 = vsyncpa [#allocation16], 0 }
  0x48   :  { %80 = vsyncpa [#allocation19], 0 }
  0x49   :  { %81 = vsyncpa [#allocation22], 0 }
  0x4a   :  { %82 = vsyncpa [#allocation25], 0 }
  0x4b   :  { %83 = vsyncpa [#allocation28], 0 }
  0x4c   :  { %84 = vsyncpa [#allocation31], 0 }
  0x4d   :  { %85 = vsyncpa [#allocation34], 0 }
  0x4e   :  { %86 = vsyncpa [#allocation5], 0 }
  0x4f   :  { %88 = vsyncpa [#allocation5 + $0x1], 0 }
  0x50   :  { %89 = vsyncpa [#allocation37], 0 }
  0x51   :  { %91 = vsyncpa [#allocation37 + $0x1], 0  ;;  %s5211_s28 = smov 0   ;;  %s5213_s0 = smov 0  }
  0x52   :  { %s5215_s1 = smov 0   ;;  %s5217_s2 = smov 0  }
  0x53 LB: > { %s5007_s7 = smov [#allocation8]   ;;  %s5232_s11 = sadd.s32 4294967295, %s4973_s2   ;;  %s4973_s2 = sphi %s5217_s2, %s6036_s2   ;;  %s4969_s1 = sphi %s5215_s1, %s6035_s1   ;;  %s4965_s0 = sphi %s5213_s0, %s6034_s0   ;;  %s4961_s28 = sphi %s5211_s28, %s6033_s28  }
  0x54   : > { %s843_s10 = sshll.u32 %s5007_s7, 4  ;;  %p3538_p0 = scmp.ge.s32.totalorder %s4973_s2, 1  ;;  %s844_s10 = int_to_ptr.vmem [resolvable:$true] %s843_s10 }
  0x55   : > { %p5920_p1 = scmp.eq.s32.totalorder %s5232_s11, 0  ;;  %p830_p2 = scmp.lt.s32.totalorder %s4973_s2, 3 }
  0x56   : > { %s5008_s16 = smov [#allocation9]   ;;  %s5009_s22 = smov [#allocation12]  }
  0x57   : > { %p5237_p3 = pnand %p3538_p0, %p830_p2  ;;  %s854_s18 = sshll.u32 %s5008_s16, 4  ;;  %s5244_s18 = int_to_ptr.vmem [resolvable:$true] %s854_s18 }
  0x58   : > { %s876_s23 = sshll.u32 %s5009_s22, 4  ;;  %s5010_s7 = smov [#allocation15]   ;;  %s5252_s23 = int_to_ptr.vmem [resolvable:$true] %s876_s23 }
  0x59   : > { %s5964_s15 = scalar_select %p5237_p3, 1, 0 }
  0x5a   : > { %p3992_p5 = pneg %p5237_p3  ;;  %s5254_s4 = sshll.u32 %s5010_s7, 4  ;;  %s899_s4 = int_to_ptr.vmem [resolvable:$true] %s5254_s4 }
  0x5b   : > { %s4296_s16 = scalar_lea.vmem %s844_s10, 16  ;;  %s4303_s22 = scalar_lea.vmem %s844_s10, 32 }
  0x5c   : > { %p5248_p6 = pnand %p3992_p5, %p5920_p1  ;;  %p4297_p8 = scmp.ne.s32.totalorder %s844_s10, %s4296_s16 }
  0x5d   : > { %p4304_p11 = scmp.lt.s32.totalorder %s844_s10, %s844_s10  ;;  %p4305_p12 = scmp.lt.s32.totalorder %s4303_s22, %s4296_s16 }
  0x5e   : > { %p5258_p7 = pneg %p5248_p6 }
  0x5f   : > { %p4306_p13 = por %p4305_p12, %p4304_p11 }
  0x60   : > { %p4299_p9 = pnand %p4297_p8, %p5258_p7 }
  0x62   : > { %p4300_p10 = pneg %p4299_p9 }
  0x64   : > { %p4307_p0 = pnand %p4306_p13, %p4300_p10 }
  0x66   : > { %4310 = shalt.err (!%p4307_p0)
}
  0x67   : > { %s5967_s21 = sld [smem:[#allocation57_spill]]  ;;  %s4322_s7 = scalar_lea.vmem %s5244_s18, 16 }
  0x68   : > { %p4323_p2 = scmp.ne.s32.totalorder %s5244_s18, %s4322_s7  ;;  %s4329_s5 = scalar_lea.vmem %s5244_s18, 32 }
  0x69   : > { %p4330_p9 = scmp.lt.s32.totalorder %s5244_s18, %s5244_s18  ;;  %p4331_p11 = scmp.lt.s32.totalorder %s4329_s5, %s4322_s7 }
  0x6a   : > { %p4325_p5 = pnand %p4323_p2, %p5258_p7 }
  0x6b   : > { %p4332_p10 = por %p4331_p11, %p4330_p9 }
  0x6c   : > { %p4326_p8 = pneg %p4325_p5 }
  0x6d   : > { %3995 = dma.hbm_to_vmem [thread:$0]  (!%p5248_p6), %s5967_s21, 16, %s844_s10, [#allocation7]  }
  0x6e   : > { %p4333_p12 = pnand %p4332_p10, %p4326_p8 }
  0x70   : > { %4336 = shalt.err (!%p4333_p12)
}
  0x71   : > { %3998 = dma.hbm_to_vmem [thread:$0]  (!%p5248_p6), %s5074_s25, 16, %s5244_s18, [#allocation10]  }
  0x72   : > { %s4348_s10 = scalar_lea.vmem %s5252_s23, 16  ;;  %s4355_s16 = scalar_lea.vmem %s5252_s23, 32 }
  0x73   : > { %p4349_p13 = scmp.ne.s32.totalorder %s5252_s23, %s4348_s10  ;;  %p4356_p5 = scmp.lt.s32.totalorder %s5252_s23, %s5252_s23 }
  0x74   : > { %p4357_p8 = scmp.lt.s32.totalorder %s4355_s16, %s4348_s10 }
  0x75   : > { %p4351_p0 = pnand %p4349_p13, %p5258_p7 }
  0x76   : > { %p4358_p9 = por %p4357_p8, %p4356_p5 }
  0x77   : > { %p4352_p2 = pneg %p4351_p0 }
  0x79   : > { %p4359_p11 = pnand %p4358_p9, %p4352_p2 }
  0x7b   : > { %4362 = shalt.err (!%p4359_p11)
}
  0x7c   : > { %s5968_s3 = sld [smem:[#allocation58_spill]]  ;;  %s5011_s5 = smov [#allocation18]  }
  0x7d   : > { %s922_s18 = sshll.u32 %s5011_s5, 4  ;;  %s4374_s22 = scalar_lea.vmem %s899_s4, 16  ;;  %s923_s18 = int_to_ptr.vmem [resolvable:$true] %s922_s18 }
  0x7e   : > { %p4375_p10 = scmp.ne.s32.totalorder %s899_s4, %s4374_s22  ;;  %s4381_s7 = scalar_lea.vmem %s899_s4, 32 }
  0x7f   : > { %p4382_p0 = scmp.lt.s32.totalorder %s899_s4, %s899_s4  ;;  %p4383_p5 = scmp.lt.s32.totalorder %s4381_s7, %s4374_s22 }
  0x80   : > { %p4377_p12 = pnand %p4375_p10, %p5258_p7 }
  0x81   : > { %p4384_p2 = por %p4383_p5, %p4382_p0 }
  0x82   : > { %4004 = dma.hbm_to_vmem [thread:$0]  (!%p5248_p6), %s5968_s3, 16, %s5252_s23, [#allocation13]  }
  0x83   : > { %p4378_p13 = pneg %p4377_p12 }
  0x85   : > { %p4385_p8 = pnand %p4384_p2, %p4378_p13 }
  0x87   : > { %4388 = shalt.err (!%p4385_p8)
}
  0x88   : > { %s5969_s14 = sld [smem:[#allocation60_spill]]  ;;  %s4400_s23 = scalar_lea.vmem %s923_s18, 256 }
  0x89   : > { %p4401_p9 = scmp.ne.s32.totalorder %s923_s18, %s4400_s23  ;;  %p4408_p1 = scmp.lt.s32.totalorder %s923_s18, %s923_s18 }
  0x8a   : > { %p4409_p10 = scmp.lt.s32.totalorder %s4400_s23, %s4400_s23 }
  0x8b   : > { %p4403_p11 = pnand %p4401_p9, %p5258_p7 }
  0x8c   : > { %p4410_p12 = por %p4409_p10, %p4408_p1 }
  0x8d   : > { %p4404_p4 = pneg %p4403_p11 }
  0x8e   : > { %4010 = dma.hbm_to_vmem [thread:$0]  (!%p5248_p6), %s5969_s14, 16, %s899_s4, [#allocation16]  }
  0x8f   : > { %p4411_p3 = pnand %p4410_p12, %p4404_p4 }
  0x91   : > { %4414 = shalt.err (!%p4411_p3)
}
  0x92   : > { %s5922_s10 = smov 64   ;;  %s5924_s16 = smov 4  }
  0x93   : > { %4016 = dma.hbm_to_vmem [thread:$0]  (!%p5248_p6), %s5109_s30, 256, %s923_s18, [#allocation19], %s5922_s10, %s5922_s10, %s5924_s16  }
  0x94   : > { %s5014_s4 = smov [#allocation21]   ;;  %s5015_s22 = smov [#allocation24]  }
  0x95   : > { %s946_s5 = sshll.u32 %s5014_s4, 4  ;;  %s970_s7 = sshll.u32 %s5015_s22, 4  ;;  %s947_s5 = int_to_ptr.vmem [resolvable:$true] %s946_s5  ;;  %s971_s7 = int_to_ptr.vmem [resolvable:$true] %s970_s7 }
  0x96   : > { %s4426_s3 = scalar_lea.vmem %s947_s5, 256  ;;  %p4434_p4 = scmp.lt.s32.totalorder %s947_s5, %s947_s5 }
  0x97   : > { %p4427_p13 = scmp.ne.s32.totalorder %s947_s5, %s4426_s3  ;;  %p4435_p0 = scmp.lt.s32.totalorder %s4426_s3, %s4426_s3 }
  0x99   : > { %p4429_p1 = pnand %p4427_p13, %p5258_p7  ;;  %p4436_p5 = por %p4435_p0, %p4434_p4 }
  0x9b   : > { %p4430_p3 = pneg %p4429_p1 }
  0x9d   : > { %p4437_p2 = pnand %p4436_p5, %p4430_p3 }
  0x9f   : > { %4440 = shalt.err (!%p4437_p2)
}
  0xa0   : > { %s5970_s12 = sld [smem:[#allocation63_spill]]  ;;  %s4452_s18 = scalar_lea.vmem %s971_s7, 256 }
  0xa1   : > { %p4453_p8 = scmp.ne.s32.totalorder %s971_s7, %s4452_s18  ;;  %p4460_p10 = scmp.lt.s32.totalorder %s971_s7, %s971_s7 }
  0xa2   : > { %p4461_p12 = scmp.lt.s32.totalorder %s4452_s18, %s4452_s18 }
  0xa3   : > { %p4455_p9 = pnand %p4453_p8, %p5258_p7 }
  0xa4   : > { %p4462_p13 = por %p4461_p12, %p4460_p10 }
  0xa5   : > { %p4456_p11 = pneg %p4455_p9 }
  0xa6   : > { %4022 = dma.hbm_to_vmem [thread:$0]  (!%p5248_p6), %s5970_s12, 256, %s947_s5, [#allocation22], %s5922_s10, %s5922_s10, %s5924_s16  }
  0xa7   : > { %p4463_p1 = pnand %p4462_p13, %p4456_p11 }
  0xa9   : > { %4466 = shalt.err (!%p4463_p1)
}
  0xaa   : > { %4028 = dma.hbm_to_vmem [thread:$0]  (!%p5248_p6), %s5129_s27, 256, %s971_s7, [#allocation25], %s5922_s10, %s5922_s10, %s5924_s16  }
  0xab   : > { %s5016_s3 = smov [#allocation27]   ;;  %s5017_s4 = smov [#allocation30]  }
  0xac   : > { %s994_s23 = sshll.u32 %s5016_s3, 4  ;;  %s1026_s5 = sshll.u32 %s5017_s4, 4  ;;  %s995_s23 = int_to_ptr.vmem [resolvable:$true] %s994_s23  ;;  %s1027_s5 = int_to_ptr.vmem [resolvable:$true] %s1026_s5 }
  0xad   : > { %s4478_s22 = scalar_lea.vmem %s995_s23, 256  ;;  %p4486_p5 = scmp.lt.s32.totalorder %s995_s23, %s995_s23 }
  0xae   : > { %p4479_p3 = scmp.ne.s32.totalorder %s995_s23, %s4478_s22  ;;  %p4487_p2 = scmp.lt.s32.totalorder %s4478_s22, %s4478_s22 }
  0xb0   : > { %p4481_p4 = pnand %p4479_p3, %p5258_p7  ;;  %p4488_p8 = por %p4487_p2, %p4486_p5 }
  0xb2   : > { %p4482_p0 = pneg %p4481_p4 }
  0xb4   : > { %p4489_p9 = pnand %p4488_p8, %p4482_p0 }
  0xb6   : > { %4492 = shalt.err (!%p4489_p9)
}
  0xb7   : > { %s5971_s9 = sld [smem:[#allocation66_spill]]  ;;  %s4504_s7 = scalar_lea.vmem %s1027_s5, 256 }
  0xb8   : > { %p4505_p11 = scmp.ne.s32.totalorder %s1027_s5, %s4504_s7  ;;  %p4512_p13 = scmp.lt.s32.totalorder %s1027_s5, %s1027_s5 }
  0xb9   : > { %p4513_p1 = scmp.lt.s32.totalorder %s4504_s7, %s4504_s7 }
  0xba   : > { %p4507_p10 = pnand %p4505_p11, %p5258_p7 }
  0xbb   : > { %p4514_p3 = por %p4513_p1, %p4512_p13 }
  0xbc   : > { %p4508_p12 = pneg %p4507_p10 }
  0xbd   : > { %4034 = dma.hbm_to_vmem [thread:$0]  (!%p5248_p6), %s5971_s9, 256, %s995_s23, [#allocation28], %s5922_s10, %s5922_s10, %s5924_s16  }
  0xbe   : > { %p4515_p4 = pnand %p4514_p3, %p4508_p12 }
  0xc0   : > { %4518 = shalt.err (!%p4515_p4)
}
  0xc1   : > { %s5972_s13 = sld [smem:[#allocation70_spill]]  ;;  %s5018_s18 = smov [#allocation11]  }
  0xc2   : > { %s865_s3 = sshll.u32 %s5018_s18, 4  ;;  %s5019_s23 = smov [#allocation14]   ;;  %s866_s3 = int_to_ptr.vmem [resolvable:$true] %s865_s3 }
  0xc3   : > { %s887_s4 = sshll.u32 %s5019_s23, 4  ;;  %s4530_s22 = scalar_lea.vmem %s866_s3, 16  ;;  %s888_s4 = int_to_ptr.vmem [resolvable:$true] %s887_s4 }
  0xc4   : > { %p4531_p0 = scmp.ne.s32.totalorder %s866_s3, %s4530_s22  ;;  %s4537_s7 = scalar_lea.vmem %s866_s3, 32 }
  0xc5   : > { %p4538_p8 = scmp.lt.s32.totalorder %s866_s3, %s866_s3  ;;  %p4539_p9 = scmp.lt.s32.totalorder %s4537_s7, %s4530_s22 }
  0xc6   : > { %p4533_p5 = pnand %p4531_p0, %p5258_p7 }
  0xc7   : > { %4040 = dma.hbm_to_vmem [thread:$0]  (!%p5248_p6), %s5972_s13, 256, %s1027_s5, [#allocation31], %s5922_s10, %s5922_s10, %s5924_s16  }
  0xc8   : > { %p4534_p2 = pneg %p4533_p5  ;;  %p4540_p11 = por %p4539_p9, %p4538_p8 }
  0xca   : > { %p4541_p10 = pnand %p4540_p11, %p4534_p2 }
  0xcc   : > { %4544 = shalt.err (!%p4541_p10)
}
  0xcd   : > { %4001 = dma.hbm_to_vmem [thread:$0]  (!%p5248_p6), %s5079_s29, 16, %s866_s3, [#allocation10]  }
  0xce   : > { %s4556_s5 = scalar_lea.vmem %s888_s4, 16  ;;  %s4563_s18 = scalar_lea.vmem %s888_s4, 32 }
  0xcf   : > { %p4557_p12 = scmp.ne.s32.totalorder %s888_s4, %s4556_s5  ;;  %p4564_p3 = scmp.lt.s32.totalorder %s888_s4, %s888_s4 }
  0xd0   : > { %p4565_p4 = scmp.lt.s32.totalorder %s4563_s18, %s4556_s5 }
  0xd1   : > { %p4559_p13 = pnand %p4557_p12, %p5258_p7 }
  0xd2   : > { %p4566_p0 = por %p4565_p4, %p4564_p3 }
  0xd3   : > { %p4560_p1 = pneg %p4559_p13 }
  0xd5   : > { %p4567_p5 = pnand %p4566_p0, %p4560_p1 }
  0xd7   : > { %4570 = shalt.err (!%p4567_p5)
}
  0xd8   : > { %s5973_s8 = sld [smem:[#allocation59_spill]]  ;;  %s5020_s23 = smov [#allocation17]  }
  0xd9   : > { %s912_s22 = sshll.u32 %s5020_s23, 4  ;;  %s5021_s3 = smov [#allocation20]   ;;  %s913_s22 = int_to_ptr.vmem [resolvable:$true] %s912_s22 }
  0xda   : > { %s936_s7 = sshll.u32 %s5021_s3, 4  ;;  %s4582_s10 = scalar_lea.vmem %s913_s22, 16  ;;  %s937_s7 = int_to_ptr.vmem [resolvable:$true] %s936_s7 }
  0xdb   : > { %p4583_p2 = scmp.ne.s32.totalorder %s913_s22, %s4582_s10  ;;  %s4589_s16 = scalar_lea.vmem %s913_s22, 32 }
  0xdc   : > { %p4590_p11 = scmp.lt.s32.totalorder %s913_s22, %s913_s22  ;;  %p4591_p10 = scmp.lt.s32.totalorder %s4589_s16, %s4582_s10 }
  0xdd   : > { %p4585_p8 = pnand %p4583_p2, %p5258_p7 }
  0xde   : > { %4007 = dma.hbm_to_vmem [thread:$0]  (!%p5248_p6), %s5973_s8, 16, %s888_s4, [#allocation13]  }
  0xdf   : > { %p4586_p9 = pneg %p4585_p8  ;;  %p4592_p12 = por %p4591_p10, %p4590_p11 }
  0xe1   : > { %p4593_p13 = pnand %p4592_p12, %p4586_p9 }
  0xe3   : > { %4596 = shalt.err (!%p4593_p13)
}
  0xe4   : > { %4013 = dma.hbm_to_vmem [thread:$0]  (!%p5248_p6), %s5104_s24, 16, %s913_s22, [#allocation16]  }
  0xe5   : > { %s4608_s4 = scalar_lea.vmem %s937_s7, 16  ;;  %s4615_s5 = scalar_lea.vmem %s937_s7, 32 }
  0xe6   : > { %p4609_p1 = scmp.ne.s32.totalorder %s937_s7, %s4608_s4  ;;  %p4616_p0 = scmp.lt.s32.totalorder %s937_s7, %s937_s7 }
  0xe7   : > { %p4617_p5 = scmp.lt.s32.totalorder %s4615_s5, %s4608_s4 }
  0xe8   : > { %p4611_p3 = pnand %p4609_p1, %p5258_p7 }
  0xe9   : > { %p4618_p2 = por %p4617_p5, %p4616_p0 }
  0xea   : > { %p4612_p4 = pneg %p4611_p3 }
  0xec   : > { %p4619_p8 = pnand %p4618_p2, %p4612_p4 }
  0xee   : > { %4622 = shalt.err (!%p4619_p8)
}
  0xef   : > { %s5974_s6 = sld [smem:[#allocation62_spill]]  ;;  %s5022_s10 = smov [#allocation23]  }
  0xf0   : > { %s960_s16 = sshll.u32 %s5022_s10, 4  ;;  %s5023_s18 = smov [#allocation26]   ;;  %s961_s16 = int_to_ptr.vmem [resolvable:$true] %s960_s16 }
  0xf1   : > { %s984_s23 = sshll.u32 %s5023_s18, 4  ;;  %s4634_s22 = scalar_lea.vmem %s961_s16, 16  ;;  %s985_s23 = int_to_ptr.vmem [resolvable:$true] %s984_s23 }
  0xf2   : > { %p4635_p9 = scmp.ne.s32.totalorder %s961_s16, %s4634_s22  ;;  %s4641_s3 = scalar_lea.vmem %s961_s16, 32 }
  0xf3   : > { %p4642_p12 = scmp.lt.s32.totalorder %s961_s16, %s961_s16  ;;  %p4643_p13 = scmp.lt.s32.totalorder %s4641_s3, %s4634_s22 }
  0xf4   : > { %p4637_p11 = pnand %p4635_p9, %p5258_p7 }
  0xf5   : > { %4019 = dma.hbm_to_vmem [thread:$0]  (!%p5248_p6), %s5974_s6, 16, %s937_s7, [#allocation19]  }
  0xf6   : > { %p4638_p10 = pneg %p4637_p11  ;;  %p4644_p1 = por %p4643_p13, %p4642_p12 }
  0xf8   : > { %p4645_p3 = pnand %p4644_p1, %p4638_p10 }
  0xfa   : > { %4648 = shalt.err (!%p4645_p3)
}
  0xfb   : > { %s5975_s20 = sld [smem:[#allocation64_spill]]  ;;  %s4660_s7 = scalar_lea.vmem %s985_s23, 16 }
  0xfc   : > { %p4661_p4 = scmp.ne.s32.totalorder %s985_s23, %s4660_s7  ;;  %s4667_s4 = scalar_lea.vmem %s985_s23, 32 }
  0xfd   : > { %p4668_p2 = scmp.lt.s32.totalorder %s985_s23, %s985_s23  ;;  %p4669_p8 = scmp.lt.s32.totalorder %s4667_s4, %s4660_s7 }
  0xfe   : > { %p4663_p0 = pnand %p4661_p4, %p5258_p7 }
  0xff   : > { %p4670_p9 = por %p4669_p8, %p4668_p2 }
 0x100   : > { %p4664_p5 = pneg %p4663_p0 }
 0x101   : > { %4025 = dma.hbm_to_vmem [thread:$0]  (!%p5248_p6), %s5975_s20, 16, %s961_s16, [#allocation22]  }
 0x102   : > { %p4671_p11 = pnand %p4670_p9, %p4664_p5 }
 0x104   : > { %4674 = shalt.err (!%p4671_p11)
}
 0x105   : > { %s5976_s5 = sld [smem:[#allocation65_spill]]  ;;  %s5024_s10 = smov [#allocation29]  }
 0x106   : > { %s1010_s18 = sshll.u32 %s5024_s10, 4  ;;  %s5025_s16 = smov [#allocation32]   ;;  %s1011_s18 = int_to_ptr.vmem [resolvable:$true] %s1010_s18 }
 0x107   : > { %s1042_s22 = sshll.u32 %s5025_s16, 4  ;;  %s4686_s3 = scalar_lea.vmem %s1011_s18, 256  ;;  %s1043_s22 = int_to_ptr.vmem [resolvable:$true] %s1042_s22 }
 0x108   : > { %p4687_p10 = scmp.ne.s32.totalorder %s1011_s18, %s4686_s3  ;;  %p4694_p1 = scmp.lt.s32.totalorder %s1011_s18, %s1011_s18 }
 0x109   : > { %p4695_p3 = scmp.lt.s32.totalorder %s4686_s3, %s4686_s3 }
 0x10a   : > { %p4689_p12 = pnand %p4687_p10, %p5258_p7 }
 0x10b   : > { %4031 = dma.hbm_to_vmem [thread:$0]  (!%p5248_p6), %s5976_s5, 16, %s985_s23, [#allocation25]  }
 0x10c   : > { %p4690_p13 = pneg %p4689_p12  ;;  %p4696_p4 = por %p4695_p3, %p4694_p1 }
 0x10e   : > { %p4697_p0 = pnand %p4696_p4, %p4690_p13 }
 0x110   : > { %4700 = shalt.err (!%p4697_p0)
}
 0x111   : > { %s5977_s7 = smov 4   ;;  %s5978_s4 = smov 64  }
 0x112   : > { %s5979_s23 = sld [smem:[#allocation68_spill]]  ;;  %s4712_s5 = scalar_lea.vmem %s1043_s22, 256 }
 0x113   : > { %p4713_p5 = scmp.ne.s32.totalorder %s1043_s22, %s4712_s5  ;;  %p4720_p9 = scmp.lt.s32.totalorder %s1043_s22, %s1043_s22 }
 0x114   : > { %p4721_p11 = scmp.lt.s32.totalorder %s4712_s5, %s4712_s5 }
 0x115   : > { %p4715_p2 = pnand %p4713_p5, %p5258_p7 }
 0x116   : > { %p4722_p10 = por %p4721_p11, %p4720_p9 }
 0x117   : > { %p4716_p8 = pneg %p4715_p2 }
 0x118   : > { %4037 = dma.hbm_to_vmem [thread:$0]  (!%p5248_p6), %s5979_s23, 256, %s1011_s18, [#allocation28], %s5978_s4, %s5978_s4, %s5977_s7  }
 0x119   : > { %p4723_p12 = pnand %p4722_p10, %p4716_p8 }
 0x11b   : > { %4726 = shalt.err (!%p4723_p12)
}
 0x11c   : > { %s5980_s10 = sld [smem:[#allocation72_spill]]  ;;  %s5026_s18 = smov [#allocation33]  }
 0x11d   : > { %s1058_s16 = sshll.u32 %s5026_s18, 4  ;;  %s1059_s16 = int_to_ptr.vmem [resolvable:$true] %s1058_s16 }
 0x11e   : > { %s4738_s3 = scalar_lea.vmem %s1059_s16, 256  ;;  %p4746_p4 = scmp.lt.s32.totalorder %s1059_s16, %s1059_s16 }
 0x11f   : > { %p4739_p13 = scmp.ne.s32.totalorder %s1059_s16, %s4738_s3  ;;  %p4747_p0 = scmp.lt.s32.totalorder %s4738_s3, %s4738_s3 }
 0x121   : > { %p4741_p1 = pnand %p4739_p13, %p5258_p7  ;;  %p4748_p5 = por %p4747_p0, %p4746_p4 }
 0x122   : > { %4043 = dma.hbm_to_vmem [thread:$0]  (!%p5248_p6), %s5980_s10, 256, %s1043_s22, [#allocation31], %s5978_s4, %s5978_s4, %s5977_s7  }
 0x123   : > { %p4742_p3 = pneg %p4741_p1 }
 0x125   : > { %p4749_p2 = pnand %p4748_p5, %p4742_p3 }
 0x127   : > { %4752 = shalt.err (!%p4749_p2)
}
 0x128   : > { %s5981_s23 = sld [smem:[#allocation74_spill]]  ;;  %s5926_s17 = sadd.s32 4294967294, %s4973_s2  }
 0x129   : > { %s5391_s26 = sadd.s32 1, %s4973_s2   ;;  %s156_s5 = sadd.s32 1, %s4969_s1 }
 0x12a   : > { %s153_s22 = ssub.s32 %s4973_s2, %s5391_s26  ;;  %s5982_s10 = sld [smem:[#allocation55_spill]] }
 0x12b   : > { %p154_p7 = scmp.eq.s32.totalorder %s153_s22, 0  ;;  %p163_p8 = scmp.ne.s32.totalorder %s4969_s1, %s4965_s0 }
 0x12c   : > { %p164_p9 = scmp.eq.s32.totalorder %s4973_s2, 0  ;;  %p169_p11 = scmp.ne.s32.totalorder %s4965_s0, %s4961_s28 }
 0x12d   : > { %s5402_s18 = scalar_select %p154_p7, %s4969_s1, %s156_s5  }
 0x12e   : > { %4046 = dma.hbm_to_vmem [thread:$0]  (!%p5248_p6), %s5981_s23, 256, %s1059_s16, [#allocation34], %s5978_s4, %s5978_s4, %s5977_s7  }
 0x12f   : > { %s5983_s3 = sld [smem:[#allocation56_spill]]  ;;  %p5404_p10 = por %p164_p9, %p163_p8 }
 0x130   : > { %p5985_p6 = scmp.eq.s32.totalorder %s5232_s11, 0  ;;  %p765_p13 = scmp.eq.s32.totalorder %s5232_s11, 1 }
 0x131   : > { %p771_p1 = scmp.eq.s32.totalorder %s5926_s17, 1  ;;  %p4082_p3 = scmp.lt.s32.totalorder %s4973_s2, 2 }
 0x132   : > { %p5410_p12 = por %p5985_p6, %p169_p11  ;;  %s1096_s4 = sand.u32 1, %s4969_s1  }
 0x133   : > { %p5419_p4 = por %p765_p13, %p163_p8  ;;  %p5423_p0 = por %p771_p1, %p169_p11 }
 0x134   : > { %s5986_s7 = scalar_select %p5410_p12, 1, 0 }
 0x135   : > { %s5987_s16 = scalar_select %p5419_p4, 1, 0 }
 0x136   : > { %s5988_s23 = scalar_select %p5423_p0, 1, 0 }
 0x137   : > { %s5427_s22 = sshll.u32 %s1096_s4, 3  ;;  %s3559_s5 = sshll.u32 %s4973_s2, 7 }
 0x138   : > { %s5431_s8 = scalar_lea.hbm %s5982_s10, %s3559_s5  ;;  %s1100_s17 = scalar_lea.vmem [#allocation3], %s5427_s22 }
 0x139   : > { %s1107_s9 = sshll.u32 %s1100_s17, 4  ;;  %p5438_p5 = pnand %p4082_p3, %p5404_p10  ;;  %s5434_s9 = int_to_ptr.vmem [resolvable:$true] %s1107_s9 }
 0x13a   : > { %s5443_s13 = scalar_lea.hbm %s5983_s3, %s3559_s5  ;;  %s1097_s20 = scalar_lea.sflag [#allocation4], %s1096_s4 }
 0x13b   : > { %s4753_s21 = scalar_lea.hbm %s5431_s8, 128  ;;  %p4755_p7 = pneg %p5438_p5 }
 0x13c   : > { %p4754_p2 = scmp.ne.s32.totalorder %s5431_s8, %s4753_s21  ;;  %s4758_s17 = scalar_lea.hbm %s5982_s10, 256 }
 0x13d   : > { %p4759_p11 = scmp.lt.s32.totalorder %s5431_s8, %s5982_s10  ;;  %p4760_p10 = scmp.lt.s32.totalorder %s4758_s17, %s4753_s21 }
 0x13e   : > { %p4756_p8 = pnand %p4755_p7, %p4754_p2 }
 0x13f   : > { %p4761_p6 = por %p4760_p10, %p4759_p11 }
 0x140   : > { %p4757_p9 = pneg %p4756_p8 }
 0x142   : > { %p4762_p13 = pnand %p4761_p6, %p4757_p9 }
 0x144   : > { %4765 = shalt.err (!%p4762_p13)
}
 0x145   : > { %s4766_s6 = scalar_lea.vmem %s5434_s9, 128  ;;  %s5027_s4 = smov [#allocation3]  }
 0x146   : > { %p4767_p1 = scmp.ne.s32.totalorder %s5434_s9, %s4766_s6  ;;  %s4771_s5 = sshll.u32 %s5027_s4, 4  ;;  %s4772_s5 = int_to_ptr.vmem [resolvable:$false] %s4771_s5 }
 0x147   : > { %s4773_s14 = scalar_lea.vmem %s4772_s5, 256  ;;  %p4774_p2 = scmp.lt.s32.totalorder %s5434_s9, %s4772_s5 }
 0x148   : > { %p4769_p3 = pnand %p4767_p1, %p4755_p7  ;;  %p4775_p8 = scmp.lt.s32.totalorder %s4773_s14, %s4766_s6 }
 0x14a   : > { %p4770_p0 = pneg %p4769_p3  ;;  %p4776_p4 = por %p4775_p8, %p4774_p2 }
 0x14c   : > { %p4777_p11 = pnand %p4776_p4, %p4770_p0 }
 0x14e   : > { %4780 = shalt.err (!%p4777_p11)
}
 0x14f   : > { %4050 = dma.hbm_to_vmem [thread:$0]  (!%p5438_p5), %s5431_s8, 128, %s5434_s9, %s1097_s20  }
 0x150   : > { %s1118_s21 = scalar_lea.vmem [#allocation6], %s5427_s22  ;;  %s5990_s14 = sand.u32 1, %s4973_s2  }
 0x151   : > { %s1125_s17 = sshll.u32 %s1118_s21, 4  ;;  %s1115_s6 = scalar_lea.sflag [#allocation7], %s5990_s14  ;;  %s1126_s17 = int_to_ptr.vmem [resolvable:$true] %s1125_s17 }
 0x152   : > { %s4781_s4 = scalar_lea.hbm %s5443_s13, 128  ;;  %s4786_s5 = scalar_lea.hbm %s5983_s3, 256 }
 0x153   : > { %p4782_p4 = scmp.ne.s32.totalorder %s5443_s13, %s4781_s4  ;;  %p4787_p10 = scmp.lt.s32.totalorder %s5443_s13, %s5983_s3 }
 0x154   : > { %p4788_p6 = scmp.lt.s32.totalorder %s4786_s5, %s4781_s4 }
 0x155   : > { %p4784_p0 = pnand %p4782_p4, %p4755_p7 }
 0x156   : > { %p4789_p13 = por %p4788_p6, %p4787_p10 }
 0x157   : > { %p4785_p9 = pneg %p4784_p0 }
 0x159   : > { %p4790_p1 = pnand %p4789_p13, %p4785_p9 }
 0x15b   : > { %4793 = shalt.err (!%p4790_p1)
}
 0x15c   : > { %s4794_s10 = scalar_lea.vmem %s1126_s17, 128  ;;  %s5028_s9 = smov [#allocation6]  }
 0x15d   : > { %p4795_p3 = scmp.ne.s32.totalorder %s1126_s17, %s4794_s10  ;;  %s4799_s8 = sshll.u32 %s5028_s9, 4  ;;  %s4800_s8 = int_to_ptr.vmem [resolvable:$false] %s4799_s8 }
 0x15e   : > { %s4801_s20 = scalar_lea.vmem %s4800_s8, 256  ;;  %p4802_p11 = scmp.lt.s32.totalorder %s1126_s17, %s4800_s8 }
 0x15f   : > { %p4797_p2 = pnand %p4795_p3, %p4755_p7  ;;  %p4803_p4 = scmp.lt.s32.totalorder %s4801_s20, %s4794_s10 }
 0x161   : > { %p4798_p8 = pneg %p4797_p2  ;;  %p4804_p0 = por %p4803_p4, %p4802_p11 }
 0x163   : > { %p4805_p12 = pnand %p4804_p0, %p4798_p8 }
 0x165   : > { %4808 = shalt.err (!%p4805_p12)
}
 0x166   : > { %4053 = dma.hbm_to_vmem [thread:$0]  (!%p5438_p5), %s5443_s13, 128, %s1126_s17, %s1115_s6  }
 0x167   : > { %p5991_p9 = scmp.ne.s32.totalorder %s5964_s15, 0 }
 0x168   : > { %s5486_s22 = sand.u32 (!%p5991_p9), 1, %s4965_s0   ;;  %p5992_p7 = scmp.ne.s32.totalorder (!%p5991_p9), %s5986_s7, 0 }
 0x169   : > { %1134 = sbr.rel (%p5991_p9) target bundleno = 4535 (0x11b7), region = 140  ;;  %s5489_s21 = sshll.u32 (!%p5991_p9), %s5486_s22, 3 }
 0x16a   : > { %s1137_s10 = scalar_lea.sflag (!%p5991_p9), [#allocation4], %s5486_s22  ;;  %s1140_s14 = scalar_lea.vmem (!%p5991_p9), [#allocation3], %s5489_s21 }
 0x16e   : > { %4904 = dma.done.wait (%p5992_p7), %s1137_s10, 128  }
 0x16f   : > { %4906 = vsyncadd (%p5992_p7), %s1137_s10, 4294967168  ;;  %s5930_s13 = sand.u32 1, %s5232_s11   ;;  %s1149_s15 = scalar_lea.vmem [#allocation6], %s5489_s21 }
 0x170   : > { %s1146_s12 = scalar_lea.sflag [#allocation7], %s5930_s13 }
 0x171   : > { %4908 = dma.done.wait (%p5992_p7), %s1146_s12, 128  }
 0x172   : > { %4910 = vsyncadd (%p5992_p7), %s1146_s12, 4294967168  ;;  %p5993_p12 = scmp.eq.s32.totalorder %s5232_s11, 0 }
 0x174   : > { %4912 = dma.done.wait (%p5993_p12), [#allocation7], 16   ;;  %p5994_p5 = pmov %p5993_p12 }
 0x176   : > { %4914 = vsyncadd (%p5994_p5), [#allocation7], 4294967280  ;;  %p5995_p10 = pmov %p5994_p5 }
 0x177   : > { %p5996_p6 = pmov %p5994_p5 }
 0x178   : > { %4916 = dma.done.wait (%p5995_p10), [#allocation10], 32  }
 0x179   : > { %4918 = vsyncadd (%p5996_p6), [#allocation10], 4294967264  ;;  %p5997_p13 = pmov %p5994_p5 }
 0x17a   : > { %p5998_p1 = pmov %p5994_p5 }
 0x17b   : > { %4920 = dma.done.wait (%p5997_p13), [#allocation13], 32  }
 0x17c   : > { %4922 = vsyncadd (%p5998_p1), [#allocation13], 4294967264  ;;  %p5999_p3 = pmov %p5998_p1 }
 0x17d   : > { %p6000_p2 = pmov %p5998_p1 }
 0x17e   : > { %4924 = dma.done.wait (%p5999_p3), [#allocation16], 32  }
 0x17f   : > { %4926 = vsyncadd (%p6000_p2), [#allocation16], 4294967264  ;;  %p6001_p8 = pmov %p5998_p1 }
 0x180   : > { %p6002_p11 = pmov %p5998_p1 }
 0x181   : > { %4928 = dma.done.wait (%p6001_p8), [#allocation19], 272  }
 0x182   : > { %4930 = vsyncadd (%p6002_p11), [#allocation19], 4294967024  ;;  %p6003_p4 = pmov %p5998_p1 }
 0x183   : > { %p6004_p0 = pmov %p5998_p1 }
 0x184   : > { %4932 = dma.done.wait (%p6003_p4), [#allocation22], 272  }
 0x185   : > { %4934 = vsyncadd (%p6004_p0), [#allocation22], 4294967024  ;;  %p6005_p9 = pmov %p6004_p0 }
 0x186   : > { %p6006_p7 = pmov %p6004_p0 }
 0x187   : > { %4936 = dma.done.wait (%p6005_p9), [#allocation25], 272  }
 0x188   : > { %4938 = vsyncadd (%p6006_p7), [#allocation25], 4294967024  ;;  %p6007_p12 = pmov %p6004_p0 }
 0x189   : > { %p6008_p5 = pmov %p6004_p0 }
 0x18a   : > { %4940 = dma.done.wait (%p6007_p12), [#allocation28], 512  }
 0x18b   : > { %4942 = vsyncadd (%p6008_p5), [#allocation28], 4294966784  ;;  %p6009_p10 = pmov %p6004_p0 }
 0x18c   : > { %p6010_p6 = pmov %p6004_p0 }
 0x18d   : > { %4944 = dma.done.wait (%p6009_p10), [#allocation31], 512  }
 0x18e   : > { %4946 = vsyncadd (%p6010_p6), [#allocation31], 4294966784  ;;  %p6011_p13 = pmov %p6004_p0 }
 0x18f   : > { %p6012_p1 = pmov %p6004_p0 }
 0x190   : > { %4948 = dma.done.wait (%p6011_p13), [#allocation34], 256  }
 0x191   : > { %4950 = vsyncadd (%p6012_p1), [#allocation34], 4294967040  ;;  %s6013_s7 = sld [smem:[#allocation53_spill]]  ;;  %p1326_p3 = scmp.lt.s32.totalorder %s5232_s11, 1  ;;  %vm1345_vm0 = vcmask 261120   ;;  %v4226_v8 = vld [vmem:[#allocation18 + $0x8] sm:$0xff]  }
 0x192   : > { %s6014_s17 = sld [smem:[#allocation61_spill]]  ;;  %v5029_v9 = vmov 0.0   ;;  %v4228_v11 = vld [vmem:[#allocation18] sm:$0xff]   ;;  %vm5030_vm1 = vmmov 0   ;;  %v3589_v16 = vld [vmem:[#allocation8] ss:$0 sm:$0xff] }
 0x193   : > { %s5547_s6 = scalar_select %p1326_p3, %s5232_s11, 1  ;;  %3730 = vmatprep.subr.bf16.mxu0 %v5029_v9  ;;  %3738 = vmatprep.subr.bf16.mxu1 %v5029_v9  ;;  %v3590_v18 = vld [vmem:[#allocation9] ss:$0 sm:$0xff]  ;;  %v4229_v21 = vld [vmem:[#allocation21 + $0x8] sm:$0xff]   ;;  %v3595_v25 = vld [vmem:[#allocation20] ss:$0 sm:$0xff] }
 0x194   : > { %3739 = vmatpush3.bf16.msra.mxu1 %v4226_v8  ;;  %3734 = vmatprep.mubr.msk.bf16.mxu0 %vm5030_vm1, %v5029_v9  ;;  %v4230_v23 = vld [vmem:[#allocation21] sm:$0xff]   ;;  %v3591_v24 = vld [vmem:[#allocation17] ss:$0 sm:$0xff]  ;;  %vm1610_vm2 = vcmask 64512   ;;  %s5031_s9 = smov 120   ;;  %s5032_s8 = smov 112  }
 0x195   : > { %s3586_s4 = sshll.u32 %s5547_s6, 3  ;;  %3740 = vmatprep.subr.bf16.mxu1 %v5029_v9  ;;  %3742 = vmatprep.mubr.msk.bf16.mxu1 %vm5030_vm1, %v5029_v9  ;;  %s5033_s20 = smov 104   ;;  %v3599_v47 = vld [vmem:[#allocation23] ss:$0 sm:$0xff]  ;;  %vm1856_vm3 = vcmask 1043456   ;;  %v1339_v63 = vld [vmem:[%s1140_s14] sm:$0xff] }
 0x196   : > { %vm1340_vm4 = vcmp.gt.f32.partialorder %v1339_v63, 0.0  ;;  %s3584_s10 = sshll.u32 %s5486_s22, 5  ;;  %s5034_s12 = smov 8   ;;  %vm2043_vm5 = vcmask 130112   ;;  %vm2049_vm6 = vcmask 195712   ;;  %vm2055_vm7 = vcmask 261312  }
 0x197   : > { %s1329_s5 = scalar_lea.vmem %s6013_s7, %s3586_s4  ;;  %s5632_s14 = scalar_lea.vmem [#allocation36], %s3584_s10  ;;  %vm2607_vm9 = vcmask 130048   ;;  %vm3054_vm10 = vcmask 523264  }
 0x198   : > { %v5551_v0 = vld [vmem:[%s1329_s5] sm:$0xff]  ;;  %v4225_v7 = vld [vmem:[%s6014_s17 + $0x8] sm:$0xff]   ;;  %3741 = vmatpush3.bf16.msra.mxu1 %v4228_v11  ;;  %s5932_s7 = smov 16   ;;  %s5931_s4 = smov 24  }
 0x199   : > { %v1346_v1 = vsel %vm1345_vm0, %v5551_v0, 0.0  ;;  %3731 = vmatpush3.bf16.msra.mxu0 %v4225_v7  ;;  %v4227_v10 = vld [vmem:[%s6014_s17] sm:$0xff]   ;;  %3754 = vmatprep.subr.bf16.mxu1 %v5029_v9  ;;  %s6015_s5 = sld [smem:[#allocation54_spill]]  ;;  %s3663_s13 = sshll.u32 %s5547_s6, 4 }
 0x19a   : > { %1347 = vadd.xlane.f32.xlu0 %v1346_v1  ;;  %3732 = vmatprep.subr.bf16.mxu0 %v5029_v9  ;;  %s6018_s6 = sld [smem:[#allocation71_spill]]  ;;  %p6025_p8 = scmp.ne.s32.totalorder %s5987_s16, 0 }
 0x19d   : > { %3733 = vmatpush3.bf16.msra.mxu0 %v4227_v10 }
 0x19e   : > { %3746 = vmatprep.subr.bf16.mxu0 %v5029_v9 }
 0x223   : > { %v1348_v2 = vpop.xlane.xlu0 %1347 }
 0x224   : > { %v1350_v3 = vmul.f32 0.03125, %v1348_v2 }
 0x226   : > { %v1351_v4 = vsub.f32 %v5551_v0, %v1350_v3 }
 0x228   : > { %v1352_v5 = vmul.f32 %v1351_v4, %v1351_v4 }
 0x22a   : > { %v1353_v6 = vsel %vm1345_vm0, %v1352_v5, 0.0 }
 0x22b   : > { %1354 = vadd.xlane.f32.xlu0 %v1353_v6 }
 0x2b4   : > { %v1355_v12 = vpop.xlane.xlu0 %1354 }
 0x2b5   : > { %v1356_v13 = vmul.f32 0.03125, %v1355_v12 }
 0x2b7   : > { %v1357_v14 = vadd.f32 1e-12, %v1356_v13 }
 0x2b9   : > { %4247 = vrsqrt.f32 %v1357_v14 }
 0x2c6   : > { %v4248_v15 = vpop.eup %4247 }
 0x2c7   : > { %v1359_v17 = vmul.f32 %v4248_v15, %v1351_v4 }
 0x2c9   : > { %v1366_v19 = vmul.f32 %v3589_v16, %v1359_v17 }
 0x2cb   : > { %v1373_v20 = vadd.f32 %v3590_v18, %v1366_v19 }
 0x2cd   : > { %v1374_v22 = vpack.c.bf16 %v1373_v20, %v1373_v20 }
 0x2cf   : > { %3735 = vmatmul.mubr.msk.bf16.vlgmr.msra.gmra.mxu0 %vm1345_vm0, %v1374_v22  ;;  %3743 = vmatmul.mubr.msk.bf16.vlgmr.msra.gmra.mxu1 %vm1345_vm0, %v1374_v22 }
 0x2d0   : > { %3747 = vmatpush3.bf16.msra.mxu0 %v4229_v21  ;;  %3750 = vmatprep.mubr.msk.bf16.mxu0 %vm5030_vm1, %v5029_v9 }
 0x2d1   : > { %3748 = vmatprep.subr.bf16.mxu0 %v5029_v9  ;;  %3756 = vmatprep.mubr.msk.bf16.mxu1 %vm5030_vm1, %v5029_v9 }
 0x2d4   : > { %3749 = vmatpush3.bf16.msra.mxu0 %v4230_v23 }
 0x2d5   : > { %3760 = vmatprep.subr.bf16.mxu0 %v5029_v9 }
 0x2d7   : > { %3751 = vmatmul.mubr.msk.bf16.vlgmr.msra.gmra.mxu0 %vm1345_vm0, %v1374_v22 }
 0x2d8   : > { %3762 = vmatprep.mubr.msk.bf16.mxu0 %vm5030_vm1, %v5029_v9 }
 0x38f   : > { %v1435_v26 = vpop.f32.mrf.mxu0  ;;  %v1498_v27 = vpop.f32.mrf.mxu1 }
 0x390   : > { %v1436_v28 = vadd.f32 %v3591_v24, %v1435_v26  ;;  %v1499_v29 = vadd.f32 %v3595_v25, %v1498_v27 }
 0x391   : > { %v3736_v30 = vpop.f32.mrf.mxu0  ;;  %v3744_v31 = vpop.f32.mrf.mxu1 }
 0x392   : > { %v1567_v32 = vmul.f32 0.35355338, %v1436_v28  ;;  %1583 = vrot.lane.b32.xlu1 %v1499_v29, %s5031_s9  ;;  %v1592_v33 = vpack.c.bf16 %v1499_v29, %v1499_v29 }
 0x393   : > { %v1438_v34 = vpop.f32.mrf.mxu0  ;;  %v1501_v35 = vpop.f32.mrf.mxu1 }
 0x394   : > { %1569 = vrot.lane.b32.xlu0 %v1567_v32, %s5031_s9  ;;  %v1615_v36 = vsel %vm1610_vm2, %v1592_v33, 0  ;;  %v1578_v41 = vpack.c.bf16 %v1567_v32, %v1567_v32 }
 0x395   : > { %v3737_v37 = vpop.f32.mrf.mxu0  ;;  %v3745_v38 = vpop.f32.mrf.mxu1  ;;  %3755 = vmatpush3.bf16.xpose.msra.mxu1 %v1615_v36 }
 0x396   : > { %1586 = vrot.lane.b32.xlu1 %v1499_v29, %s5032_s8  ;;  %3766 = vmatprep.subr.bf16.mxu1 %v5029_v9 }
 0x397   : > { %v1561_v39 = vpop.f32.mrf.mxu0 }
 0x398   : > { %v5593_v51 = vadd.f32 %v3599_v47, %v1561_v39 }
 0x399   : > { %v3752_v40 = vpop.f32.mrf.mxu0 }
 0x39a   : > { %1589 = vrot.lane.b32.xlu1 %v1499_v29, %s5033_s20  ;;  %v1606_v57 = vpack.c.bf16 %v5593_v51, %v5593_v51 }
 0x39b   : > { %v1564_v42 = vpop.f32.mrf.mxu0 }
 0x39c   : > { %3757 = vmatmul.mubr.msk.bf16.vlgmr.msra.gmra.mxu1 %vm1610_vm2, %v1578_v41  ;;  %v1858_v60 = vsel %vm1856_vm3, %v1606_v57, 0 }
 0x39d   : > { %v3753_v43 = vpop.f32.mrf.mxu0  ;;  %3768 = vmatprep.mubr.msk.bf16.mxu1 %vm5030_vm1, %v5029_v9 }
 0x39e   : > { %1572 = vrot.lane.b32.xlu1 %v1567_v32, %s5032_s8 }
 0x3a2   : > { %1575 = vrot.lane.b32.xlu1 %v1567_v32, %s5033_s20 }
 0x404   : > { %v1584_v44 = vpop.permute.xlu1 %1583 }
 0x405   : > { %v1593_v45 = vpack.c.bf16 %v1584_v44, %v1584_v44 }
 0x406   : > { %v1570_v50 = vpop.permute.xlu0 %1569 }
 0x407   : > { %v1661_v46 = vsel %vm1610_vm2, %v1593_v45, 0  ;;  %v1579_v54 = vpack.c.bf16 %v1570_v50, %v1570_v50 }
 0x408   : > { %v1587_v48 = vpop.permute.xlu1 %1586  ;;  %3761 = vmatpush3.bf16.xpose.msra.mxu0 %v1661_v46 }
 0x409   : > { %v1594_v49 = vpack.c.bf16 %v1587_v48, %v1587_v48  ;;  %3772 = vmatprep.subr.bf16.mxu0 %v5029_v9 }
 0x40b   : > { %v1707_v52 = vsel %vm1610_vm2, %v1594_v49, 0 }
 0x40c   : > { %v1590_v53 = vpop.permute.xlu1 %1589  ;;  %3767 = vmatpush3.bf16.xpose.msra.mxu1 %v1707_v52 }
 0x40d   : > { %v1595_v55 = vpack.c.bf16 %v1590_v53, %v1590_v53  ;;  %3778 = vmatprep.subr.bf16.mxu1 %v5029_v9 }
 0x40f   : > { %v1753_v56 = vsel %vm1610_vm2, %v1595_v55, 0  ;;  %3763 = vmatmul.mubr.msk.bf16.vlgmr.msra.gmra.mxu0 %vm1610_vm2, %v1579_v54 }
 0x410   : > { %v1573_v58 = vpop.permute.xlu1 %1572  ;;  %3773 = vmatpush3.bf16.xpose.msra.mxu0 %v1753_v56  ;;  %3774 = vmatprep.mubr.msk.bf16.mxu0 %vm5030_vm1, %v5029_v9 }
 0x411   : > { %v1580_v59 = vpack.c.bf16 %v1573_v58, %v1573_v58  ;;  %3784 = vmatprep.subr.bf16.mxu0 %v5029_v9 }
 0x413   : > { %3769 = vmatmul.mubr.msk.bf16.vlgmr.msra.gmra.mxu1 %vm1610_vm2, %v1580_v59 }
 0x414   : > { %v1576_v61 = vpop.permute.xlu1 %1575  ;;  %3779 = vmatpush3.bf16.msra.mxu1 %v1858_v60  ;;  %3780 = vmatprep.mubr.msk.bf16.mxu1 %vm5030_vm1, %v5029_v9 }
 0x415   : > { %v1581_v62 = vpack.c.bf16 %v1576_v61, %v1576_v61  ;;  %3790 = vmatprep.subr.bf16.mxu1 %v5029_v9 }
 0x417   : > { %3775 = vmatmul.mubr.msk.bf16.vlgmr.msra.gmra.mxu0 %vm1610_vm2, %v1581_v62 }
 0x418   : > { %3786 = vmatprep.mubr.msk.bf16.mxu0 %vm5030_vm1, %v5029_v9 }
 0x45c   : > { %v1651_v1 = vpop.f32.mrf.mxu1 }
 0x45d   : > { %v1797_v2 = vsel %vm1340_vm4, %v1651_v1, -3.4028235e+38 }
 0x45e   : > { %v3758_v3 = vpop.f32.mrf.mxu1  ;;  %v1801_v4 = vsel %vm1610_vm2, %v1797_v2, -inf }
 0x45f   : > { %1802 = vmax.xlane.f32.xlu1 %v1801_v4 }
 0x460   : > { %v1654_v5 = vpop.f32.mrf.mxu1 }
 0x462   : > { %v3759_v6 = vpop.f32.mrf.mxu1 }
 0x4cf   : > { %v1697_v7 = vpop.f32.mrf.mxu0 }
 0x4d0   : > { %v1798_v8 = vsel %vm1340_vm4, %v1697_v7, -3.4028235e+38 }
 0x4d1   : > { %v3764_v10 = vpop.f32.mrf.mxu0  ;;  %v1804_v11 = vsel %vm1610_vm2, %v1798_v8, -inf }
 0x4d2   : > { %1805 = vmax.xlane.f32.xlu0 %v1804_v11 }
 0x4d3   : > { %v1700_v12 = vpop.f32.mrf.mxu0  ;;  %v1743_v13 = vpop.f32.mrf.mxu1 }
 0x4d4   : > { %v1799_v14 = vsel %vm1340_vm4, %v1743_v13, -3.4028235e+38 }
 0x4d5   : > { %v3765_v15 = vpop.f32.mrf.mxu0  ;;  %v3770_v16 = vpop.f32.mrf.mxu1  ;;  %v1807_v17 = vsel %vm1610_vm2, %v1799_v14, -inf }
 0x4d6   : > { %1808 = vmax.xlane.f32.xlu1 %v1807_v17 }
 0x4d7   : > { %v1746_v18 = vpop.f32.mrf.mxu1  ;;  %v1789_v19 = vpop.f32.mrf.mxu0 }
 0x4d8   : > { %v1800_v20 = vsel %vm1340_vm4, %v1789_v19, -3.4028235e+38 }
 0x4d9   : > { %v3771_v21 = vpop.f32.mrf.mxu1  ;;  %v3776_v22 = vpop.f32.mrf.mxu0  ;;  %v1810_v23 = vsel %vm1610_vm2, %v1800_v20, -inf }
 0x4da   : > { %1811 = vmax.xlane.f32.xlu1 %v1810_v23  ;;  %v4231_v21 = vld [vmem:[#allocation24 + $0x8] sm:$0xff]   ;;  %v4232_v22 = vld [vmem:[#allocation24] sm:$0xff]  }
 0x4db   : > { %v1792_v24 = vpop.f32.mrf.mxu0 }
 0x4dd   : > { %v3777_v25 = vpop.f32.mrf.mxu0 }
 0x4e8   : > { %v1803_v26 = vpop.xlane.xlu1 %1802 }
 0x4e9   : > { %v1813_v27 = vsub.f32 %v1797_v2, %v1803_v26 }
 0x4eb   : > { %v1817_v28 = vmul.f32 1.442695, %v1813_v27 }
 0x4ed   : > { %4249 = vpow2.f32 %v1817_v28 }
 0x4fa   : > { %v4250_v29 = vpop.eup %4249 }
 0x4fb   : > { %v1825_v30 = vsel %vm1610_vm2, %v4250_v29, 0.0 }
 0x4fc   : > { %1826 = vadd.xlane.f32.xlu0 %v1825_v30 }
 0x55b   : > { %v1806_v31 = vpop.xlane.xlu0 %1805 }
 0x55c   : > { %v1814_v32 = vsub.f32 %v1798_v8, %v1806_v31 }
 0x55e   : > { %v1819_v33 = vmul.f32 1.442695, %v1814_v32  ;;  %v3611_v32 = vld [vmem:[#allocation26] ss:$0 sm:$0xff] }
 0x55f   : > { %v1809_v34 = vpop.xlane.xlu1 %1808 }
 0x560   : > { %4251 = vpow2.f32 %v1819_v33  ;;  %v1815_v35 = vsub.f32 %v1799_v14, %v1809_v34 }
 0x562   : > { %v1821_v36 = vmul.f32 1.442695, %v1815_v35 }
 0x563   : > { %v1812_v42 = vpop.xlane.xlu1 %1811 }
 0x564   : > { %4253 = vpow2.f32 %v1821_v36  ;;  %v1816_v43 = vsub.f32 %v1800_v20, %v1812_v42 }
 0x566   : > { %v1823_v44 = vmul.f32 1.442695, %v1816_v43 }
 0x56d   : > { %v4252_v37 = vpop.eup %4251 }
 0x56e   : > { %v1828_v38 = vsel %vm1610_vm2, %v4252_v37, 0.0 }
 0x56f   : > { %1829 = vadd.xlane.f32.xlu1 %v1828_v38 }
 0x571   : > { %v4254_v39 = vpop.eup %4253 }
 0x572   : > { %v1831_v40 = vsel %vm1610_vm2, %v4254_v39, 0.0 }
 0x573   : > { %1832 = vadd.xlane.f32.xlu0 %v1831_v40  ;;  %v4233_v40 = vld [vmem:[#allocation29 + $0x8] sm:$0xff]  }
 0x580   : > { %1600 = vrot.lane.b32.xlu1 %v5593_v51, %s5032_s8 }
 0x585   : > { %v1827_v41 = vpop.xlane.xlu0 %1826 }
 0x586   : > { %4255 = vrcp.f32 %v1827_v41 }
 0x587   : > { %4257 = vpow2.f32 %v1823_v44 }
 0x589   : > { %1597 = vrot.lane.b32.xlu0 %v5593_v51, %s5031_s9 }
 0x593   : > { %v4256_v45 = vpop.eup %4255 }
 0x594   : > { %v1841_v46 = vmul.f32 %v4256_v45, %v4250_v29  ;;  %v4258_v48 = vpop.eup %4257 }
 0x595   : > { %v1834_v49 = vsel %vm1610_vm2, %v4258_v48, 0.0 }
 0x596   : > { %1845 = vst.msk [vmem:[%s5632_s14] sm:$0xff] %vm1610_vm2, %v1841_v46  ;;  %v1849_v47 = vpack.c.bf16 %v1841_v46, %v1841_v46 }
 0x598   : > { %3781 = vmatmul.mubr.msk.bf16.vlgmr.msra.gmra.mxu1 %vm1610_vm2, %v1849_v47  ;;  %v4234_v47 = vld [vmem:[#allocation29] sm:$0xff]  }
 0x599   : > { %3792 = vmatprep.mubr.msk.bf16.mxu1 %vm5030_vm1, %v5029_v9 }
 0x5a4   : > { %1835 = vadd.xlane.f32.xlu1 %v1834_v49  ;;  %v4235_v49 = vld [vmem:[#allocation27 + $0x8] sm:$0xff]  }
 0x5b5   : > { %1603 = vrot.lane.b32.xlu1 %v5593_v51, %s5033_s20 }
 0x5f8   : > { %v1830_v50 = vpop.xlane.xlu1 %1829 }
 0x5f9   : > { %4259 = vrcp.f32 %v1830_v50  ;;  %v4236_v50 = vld [vmem:[#allocation27] sm:$0xff]  }
 0x5fc   : > { %v1833_v52 = vpop.xlane.xlu0 %1832  ;;  %v1601_v53 = vpop.permute.xlu1 %1600 }
 0x5fd   : > { %4261 = vrcp.f32 %v1833_v52  ;;  %v1608_v54 = vpack.c.bf16 %v1601_v53, %v1601_v53 }
 0x5ff   : > { %v1950_v55 = vsel %vm1856_vm3, %v1608_v54, 0 }
 0x600   : > { %v1598_v56 = vpop.permute.xlu0 %1597  ;;  %3791 = vmatpush3.bf16.msra.mxu1 %v1950_v55 }
 0x601   : > { %v1607_v57 = vpack.c.bf16 %v1598_v56, %v1598_v56  ;;  %3802 = vmatprep.subr.bf16.mxu1 %v5029_v9  ;;  %v3615_v56 = vld [vmem:[#allocation11] ss:$0 sm:$0xff] }
 0x603   : > { %v1904_v58 = vsel %vm1856_vm3, %v1607_v57, 0 }
 0x604   : > { %3785 = vmatpush3.bf16.msra.mxu0 %v1904_v58  ;;  %v3616_v58 = vld [vmem:[#allocation12] ss:$0 sm:$0xff] }
 0x605   : > { %3796 = vmatprep.subr.bf16.mxu0 %v5029_v9 }
 0x606   : > { %v4260_v51 = vpop.eup %4259 }
 0x607   : > { %v1842_v59 = vmul.f32 %v4260_v51, %v4252_v37 }
 0x609   : > { %1846 = vst.msk [vmem:[%s5632_s14 + $0x8] sm:$0xff] %vm1610_vm2, %v1842_v59  ;;  %v1850_v60 = vpack.c.bf16 %v1842_v59, %v1842_v59 }
 0x60a   : > { %v4262_v61 = vpop.eup %4261 }
 0x60b   : > { %3787 = vmatmul.mubr.msk.bf16.vlgmr.msra.gmra.mxu0 %vm1610_vm2, %v1850_v60  ;;  %v1843_v62 = vmul.f32 %v4262_v61, %v4254_v39 }
 0x60c   : > { %3798 = vmatprep.mubr.msk.bf16.mxu0 %vm5030_vm1, %v5029_v9 }
 0x60d   : > { %1847 = vst.msk [vmem:[%s5632_s14 + $0x10] sm:$0xff] %vm1610_vm2, %v1843_v62  ;;  %v1851_v63 = vpack.c.bf16 %v1843_v62, %v1843_v62 }
 0x60f   : > { %3793 = vmatmul.mubr.msk.bf16.vlgmr.msra.gmra.mxu1 %vm1610_vm2, %v1851_v63 }
 0x610   : > { %3806 = vmatprep.mubr.msk.bf16.mxu1 %vm5030_vm1, %v5029_v9  ;;  %3803 = vmatpush3.bf16.msra.mxu1 %v4231_v21 }
 0x611   : > { %3804 = vmatprep.subr.bf16.mxu1 %v5029_v9 }
 0x614   : > { %3805 = vmatpush3.bf16.msra.mxu1 %v4232_v22 }
 0x615   : > { %3818 = vmatprep.subr.bf16.mxu1 %v5029_v9 }
 0x62d   : > { %v1836_v1 = vpop.xlane.xlu1 %1835 }
 0x62e   : > { %4263 = vrcp.f32 %v1836_v1 }
 0x631   : > { %v1604_v2 = vpop.permute.xlu1 %1603 }
 0x632   : > { %v1609_v3 = vpack.c.bf16 %v1604_v2, %v1604_v2 }
 0x634   : > { %v1996_v4 = vsel %vm1856_vm3, %v1609_v3, 0 }
 0x635   : > { %3797 = vmatpush3.bf16.msra.mxu0 %v1996_v4 }
 0x636   : > { %3810 = vmatprep.subr.bf16.mxu0 %v5029_v9 }
 0x63b   : > { %v4264_v5 = vpop.eup %4263 }
 0x63c   : > { %v1844_v6 = vmul.f32 %v4264_v5, %v4258_v48 }
 0x63e   : > { %1848 = vst.msk [vmem:[%s5632_s14 + $0x18] sm:$0xff] %vm1610_vm2, %v1844_v6  ;;  %v1852_v7 = vpack.c.bf16 %v1844_v6, %v1844_v6 }
 0x640   : > { %3799 = vmatmul.mubr.msk.bf16.vlgmr.msra.gmra.mxu0 %vm1610_vm2, %v1852_v7 }
 0x641   : > { %3814 = vmatprep.mubr.msk.bf16.mxu0 %vm5030_vm1, %v5029_v9  ;;  %3811 = vmatpush3.bf16.msra.mxu0 %v4235_v49 }
 0x642   : > { %3812 = vmatprep.subr.bf16.mxu0 %v5029_v9 }
 0x645   : > { %3813 = vmatpush3.bf16.msra.mxu0 %v4236_v50 }
 0x646   : > { %3826 = vmatprep.subr.bf16.mxu0 %v5029_v9 }
 0x658   : > { %v1894_v8 = vpop.f32.mrf.mxu1 }
 0x659   : > { %2038 = vst.msk [vmem:[#allocation2] sm:$0xff] %vm1610_vm2, %v1894_v8  ;;  %v4237_v8 = vld [vmem:[#allocation30 + $0x8] sm:$0xff]  }
 0x65a   : > { %v3782_v10 = vpop.f32.mrf.mxu1 }
 0x65b   : > { %v4238_v10 = vld [vmem:[#allocation30] sm:$0xff]  }
 0x65c   : > { %v1897_v11 = vpop.f32.mrf.mxu1 }
 0x65e   : > { %v3783_v12 = vpop.f32.mrf.mxu1 }
 0x6cb   : > { %v1940_v13 = vpop.f32.mrf.mxu0 }
 0x6cc   : > { %2040 = vrot.lane.b32.xlu0 %v1940_v13, %s5034_s12 }
 0x6cd   : > { %v3788_v14 = vpop.f32.mrf.mxu0 }
 0x6cf   : > { %v1943_v15 = vpop.f32.mrf.mxu0  ;;  %v1986_v16 = vpop.f32.mrf.mxu1 }
 0x6d0   : > { %2046 = vrot.lane.b32.xlu1 %v1986_v16, %s5932_s7  ;;  %s6016_s7 = sld [smem:[#allocation69_spill]] }
 0x6d1   : > { %v3789_v17 = vpop.f32.mrf.mxu0  ;;  %v3794_v18 = vpop.f32.mrf.mxu1 }
 0x6d3   : > { %v1989_v19 = vpop.f32.mrf.mxu1 }
 0x6d5   : > { %v3795_v20 = vpop.f32.mrf.mxu1 }
 0x6d6   : > { %v3621_v61 = vld [vmem:[%s6016_s7] ss:$0 sm:$0xff]  ;;  %s6023_s7 = sld [smem:[#allocation75_spill]] }
 0x700   : > { %v2032_v23 = vpop.f32.mrf.mxu0 }
 0x701   : > { %2052 = vrot.lane.b32.xlu0 %v2032_v23, %s5931_s4  ;;  %s1334_s4 = scalar_lea.vmem %s6015_s5, %s3663_s13  ;;  %s6017_s13 = sld [smem:[#allocation67_spill]] }
 0x702   : > { %v3800_v24 = vpop.f32.mrf.mxu0  ;;  %v1338_v46 = vld [vmem:[%s1334_s4 + $0x8] sm:$0xff]  ;;  %s3137_s5 = sshll.u32 %s5632_s14, 4  ;;  %s5818_s5 = int_to_ptr.vmem [resolvable:$true] %s3137_s5 }
 0x704   : > { %v2035_v25 = vpop.f32.mrf.mxu0 }
 0x706   : > { %v3801_v26 = vpop.f32.mrf.mxu0 }
 0x707   : > { %v3617_v19 = vld [vmem:[%s6017_s13] ss:$0 sm:$0xff] }
 0x73e   : > { %v2041_v27 = vpop.permute.xlu0 %2040 }
 0x73f   : > { %2044 = vst.msk [vmem:[#allocation2] sm:$0xff] %vm2043_vm5, %v2041_v27 }
 0x742   : > { %v2047_v28 = vpop.permute.xlu1 %2046 }
 0x743   : > { %2050 = vst.msk [vmem:[#allocation2] sm:$0xff] %vm2049_vm6, %v2047_v28 }
 0x773   : > { %v2053_v29 = vpop.permute.xlu0 %2052 }
 0x774   : > { %2056 = vst.msk [vmem:[#allocation2] sm:$0xff] %vm2055_vm7, %v2053_v29 }
 0x77b   : > { %v2057_v30 = vld [vmem:[#allocation2] sm:$0xff] }
 0x77c   : > { %v2058_v31 = vpack.c.bf16 %v2057_v30, %v2057_v30 }
 0x77e   : > { %3807 = vmatmul.mubr.msk.bf16.vlgmr.msra.gmra.mxu1 %vm1345_vm0, %v2058_v31 }
 0x77f   : > { %3822 = vmatprep.mubr.msk.bf16.mxu1 %vm5030_vm1, %v5029_v9  ;;  %3819 = vmatpush3.bf16.msra.mxu1 %v4233_v40 }
 0x780   : > { %3820 = vmatprep.subr.bf16.mxu1 %v5029_v9 }
 0x783   : > { %3821 = vmatpush3.bf16.msra.mxu1 %v4234_v47 }
 0x784   : > { %3834 = vmatprep.subr.bf16.mxu1 %v5029_v9 }
 0x83e   : > { %v2119_v33 = vpop.f32.mrf.mxu1 }
 0x83f   : > { %v2120_v34 = vadd.f32 %v3611_v32, %v2119_v33 }
 0x840   : > { %v3808_v35 = vpop.f32.mrf.mxu1 }
 0x841   : > { %v5676_v36 = vadd.f32 %v2120_v34, %v5551_v0  ;;  %v1337_v0 = vld [vmem:[%s1334_s4] sm:$0xff]  ;;  %s5933_s4 = sshll.u32 %s5232_s11, 9 }
 0x842   : > { %v2122_v37 = vpop.f32.mrf.mxu1  ;;  %v2155_v48 = vpack.c.bf16 %v1338_v46, %v1337_v0  ;;  %s5816_s13 = scalar_lea.hbm %s5204_s19, %s5933_s4 }
 0x843   : > { %v2128_v38 = vsel %vm1345_vm0, %v5676_v36, 0.0  ;;  %v3625_v37 = vld [vmem:[%s6018_s6] ss:$0 sm:$0xff]  ;;  %s6024_s6 = sand.u32 1, %s5232_s11  }
 0x844   : > { %2129 = vadd.xlane.f32.xlu1 %v2128_v38  ;;  %v3809_v39 = vpop.f32.mrf.mxu1  ;;  %3823 = vmatmul.mubr.msk.bf16.vlgmr.msra.gmra.mxu1 %vm1345_vm0, %v2155_v48 }
 0x845   : > { %3836 = vmatprep.mubr.msk.bf16.mxu1 %vm5030_vm1, %v5029_v9 }
 0x8cd   : > { %v2130_v41 = vpop.xlane.xlu1 %2129 }
 0x8ce   : > { %v2131_v42 = vmul.f32 0.03125, %v2130_v41 }
 0x8d0   : > { %v2132_v43 = vsub.f32 %v5676_v36, %v2131_v42 }
 0x8d2   : > { %v2133_v44 = vmul.f32 %v2132_v43, %v2132_v43 }
 0x8d4   : > { %v2134_v45 = vsel %vm1345_vm0, %v2133_v44, 0.0 }
 0x8d5   : > { %2135 = vadd.xlane.f32.xlu0 %v2134_v45 }
 0x904   : > { %v2283_v62 = vpop.f32.mrf.mxu1 }
 0x905   : > { %v2284_v1 = vadd.f32 %v3621_v61, %v2283_v62 }
 0x906   : > { %v3824_v63 = vpop.f32.mrf.mxu1 }
 0x908   : > { %v2286_v2 = vpop.f32.mrf.mxu1 }
 0x909   : > { %v2287_v3 = vadd.f32 %v3621_v61, %v2286_v2 }
 0x90a   : > { %v3825_v4 = vpop.f32.mrf.mxu1 }
 0x90b   : > { %v4195_v5 = vpack.i.bf16 %v2287_v3, %v2284_v1  ;;  %v2389_v6 = vpack.c.bf16 %v2287_v3, %v2284_v1 }
 0x90d   : > { %4196 = vrot.lane.b32.xlu0 %v4195_v5, %s5031_s9  ;;  %4201 = vrot.lane.b32.xlu1 %v4195_v5, %s5032_s8  ;;  %v2421_v7 = vsel %vm1610_vm2, %v2389_v6, 0 }
 0x90e   : > { %3835 = vmatpush3.bf16.xpose.msra.mxu1 %v2421_v7 }
 0x90f   : > { %3846 = vmatprep.subr.bf16.mxu1 %v5029_v9 }
 0x911   : > { %4206 = vrot.lane.b32.xlu0 %v4195_v5, %s5033_s20 }
 0x95e   : > { %v2136_v52 = vpop.xlane.xlu0 %2135 }
 0x95f   : > { %v2137_v53 = vmul.f32 0.03125, %v2136_v52 }
 0x961   : > { %v2138_v54 = vadd.f32 1e-12, %v2137_v53 }
 0x963   : > { %4265 = vrsqrt.f32 %v2138_v54 }
 0x970   : > { %v4266_v55 = vpop.eup %4265 }
 0x971   : > { %v2140_v57 = vmul.f32 %v4266_v55, %v2132_v43 }
 0x973   : > { %v2147_v51 = vmul.f32 %v3615_v56, %v2140_v57 }
 0x975   : > { %v2154_v59 = vadd.f32 %v3616_v58, %v2147_v51 }
 0x977   : > { %v2156_v60 = vpack.c.bf16 %v2154_v59, %v2154_v59 }
 0x979   : > { %3815 = vmatmul.mubr.msk.bf16.vlgmr.msra.gmra.mxu0 %vm1345_vm0, %v2156_v60 }
 0x97a   : > { %3830 = vmatprep.mubr.msk.bf16.mxu0 %vm5030_vm1, %v5029_v9  ;;  %3827 = vmatpush3.bf16.msra.mxu0 %v4237_v8 }
 0x97b   : > { %3828 = vmatprep.subr.bf16.mxu0 %v5029_v9 }
 0x97e   : > { %3829 = vmatpush3.bf16.msra.mxu0 %v4238_v10 }
 0x97f   : > { %3840 = vmatprep.subr.bf16.mxu0 %v5029_v9  ;;  %v4197_v11 = vpop.permute.xlu0 %4196  ;;  %v4202_v16 = vpop.permute.xlu1 %4201 }
 0x980   : > { %v4199_v12 = vunpack.i.h.bf16 %v4197_v11  ;;  %v4198_v13 = vunpack.i.l.bf16 %v4197_v11  ;;  %v4204_v17 = vunpack.i.h.bf16 %v4202_v16  ;;  %v4203_v18 = vunpack.i.l.bf16 %v4202_v16 }
 0x981   : > { %3831 = vmatmul.mubr.msk.bf16.vlgmr.msra.gmra.mxu0 %vm1345_vm0, %v2155_v48  ;;  %v1341_v48 = vld [vmem:[%s1149_s15] sm:$0xff]  ;;  %s5754_s15 = scalar_lea.vmem [#allocation38], %s3584_s10  ;;  %s6022_s10 = sld [smem:[#allocation76_spill]] }
 0x982   : > { %3842 = vmatprep.mubr.msk.bf16.mxu0 %vm5030_vm1, %v5029_v9  ;;  %v2390_v14 = vpack.c.bf16 %v4199_v12, %v4198_v13  ;;  %v2391_v22 = vpack.c.bf16 %v4204_v17, %v4203_v18  ;;  %vm1342_vm8 = vcmp.gt.f32.partialorder %v1341_v48, 0.0 }
 0x983   : > { %v4207_v33 = vpop.permute.xlu0 %4206 }
 0x984   : > { %v2467_v15 = vsel %vm1610_vm2, %v2390_v14, 0  ;;  %v2513_v27 = vsel %vm1610_vm2, %v2391_v22, 0  ;;  %v4209_v34 = vunpack.i.h.bf16 %v4207_v33  ;;  %v4208_v35 = vunpack.i.l.bf16 %v4207_v33 }
 0x985   : > { %3841 = vmatpush3.bf16.xpose.msra.mxu0 %v2467_v15 }
 0x986   : > { %3852 = vmatprep.subr.bf16.mxu0 %v5029_v9  ;;  %v2392_v38 = vpack.c.bf16 %v4209_v34, %v4208_v35 }
 0x988   : > { %v2559_v43 = vsel %vm1610_vm2, %v2392_v38, 0 }
 0xa39   : > { %v2217_v20 = vpop.f32.mrf.mxu0 }
 0xa3a   : > { %v2218_v21 = vadd.f32 %v3617_v19, %v2217_v20 }
 0xa3b   : > { %v3816_v23 = vpop.f32.mrf.mxu0 }
 0xa3c   : > { %v2354_v24 = vmul.f32 0.35355338, %v2218_v21 }
 0xa3d   : > { %v2220_v25 = vpop.f32.mrf.mxu0 }
 0xa3e   : > { %v2365_v26 = vpack.c.bf16 %v2354_v24, %v2354_v24  ;;  %2362 = vrot.lane.b32.xlu0 %v2354_v24, %s5033_s20  ;;  %2356 = vrot.lane.b32.xlu1 %v2354_v24, %s5031_s9 }
 0xa3f   : > { %v3817_v28 = vpop.f32.mrf.mxu0 }
 0xa40   : > { %3837 = vmatmul.mubr.msk.bf16.vlgmr.msra.gmra.mxu1 %vm1610_vm2, %v2365_v26 }
 0xa41   : > { %3847 = vmatpush3.bf16.xpose.msra.mxu1 %v2513_v27  ;;  %3848 = vmatprep.mubr.msk.bf16.mxu1 %vm5030_vm1, %v5029_v9  ;;  %v2347_v29 = vpop.f32.mrf.mxu0 }
 0xa42   : > { %2359 = vrot.lane.b32.xlu1 %v2354_v24, %s5032_s8  ;;  %3858 = vmatprep.subr.bf16.mxu1 %v5029_v9  ;;  %v5717_v40 = vadd.f32 %v3625_v37, %v2347_v29 }
 0xa43   : > { %v3832_v30 = vpop.f32.mrf.mxu0 }
 0xa45   : > { %v2350_v31 = vpop.f32.mrf.mxu0 }
 0xa46   : > { %v5719_v41 = vadd.f32 %v3625_v37, %v2350_v31 }
 0xa47   : > { %v3833_v32 = vpop.f32.mrf.mxu0 }
 0xa48   : > { %v2413_v45 = vpack.c.bf16 %v5719_v41, %v5717_v40  ;;  %v4215_v26 = vpack.i.bf16 %v5719_v41, %v5717_v40 }
 0xab0   : > { %v2357_v39 = vpop.permute.xlu1 %2356  ;;  %v2363_v46 = vpop.permute.xlu0 %2362 }
 0xab1   : > { %v2366_v42 = vpack.c.bf16 %v2357_v39, %v2357_v39  ;;  %v2368_v47 = vpack.c.bf16 %v2363_v46, %v2363_v46 }
 0xab3   : > { %3843 = vmatmul.mubr.msk.bf16.vlgmr.msra.gmra.mxu0 %vm1610_vm2, %v2366_v42 }
 0xab4   : > { %3853 = vmatpush3.bf16.xpose.msra.mxu0 %v2559_v43  ;;  %v2360_v44 = vpop.permute.xlu1 %2359  ;;  %3854 = vmatprep.mubr.msk.bf16.mxu0 %vm5030_vm1, %v5029_v9 }
 0xab5   : > { %v2367_v0 = vpack.c.bf16 %v2360_v44, %v2360_v44  ;;  %3864 = vmatprep.subr.bf16.mxu0 %v5029_v9 }
 0xab7   : > { %3849 = vmatmul.mubr.msk.bf16.vlgmr.msra.gmra.mxu1 %vm1610_vm2, %v2367_v0 }
 0xab8   : > { %3859 = vmatpush3.bf16.msra.mxu1 %v2413_v45  ;;  %3860 = vmatprep.mubr.msk.bf16.mxu1 %vm5030_vm1, %v5029_v9 }
 0xab9   : > { %3870 = vmatprep.subr.bf16.mxu1 %v5029_v9 }
 0xabb   : > { %3855 = vmatmul.mubr.msk.bf16.vlgmr.msra.gmra.mxu0 %vm1610_vm2, %v2368_v47 }
 0xabc   : > { %3866 = vmatprep.mubr.msk.bf16.mxu0 %vm5030_vm1, %v5029_v9 }
 0xb00   : > { %v2457_v49 = vpop.f32.mrf.mxu1 }
 0xb01   : > { %v2603_v50 = vsel %vm1342_vm8, %v2457_v49, -3.4028235e+38 }
 0xb02   : > { %v3838_v52 = vpop.f32.mrf.mxu1  ;;  %v2608_v53 = vsel %vm2607_vm9, %v2603_v50, -inf }
 0xb03   : > { %2609 = vmax.xlane.f32.xlu1 %v2608_v53 }
 0xb04   : > { %v2460_v54 = vpop.f32.mrf.mxu1 }
 0xb06   : > { %v3839_v55 = vpop.f32.mrf.mxu1 }
 0xb73   : > { %v2503_v56 = vpop.f32.mrf.mxu0 }
 0xb74   : > { %v2604_v57 = vsel %vm1342_vm8, %v2503_v56, -3.4028235e+38 }
 0xb75   : > { %v3844_v58 = vpop.f32.mrf.mxu0  ;;  %v2611_v51 = vsel %vm2607_vm9, %v2604_v57, -inf }
 0xb76   : > { %2612 = vmax.xlane.f32.xlu0 %v2611_v51 }
 0xb77   : > { %v2506_v59 = vpop.f32.mrf.mxu0  ;;  %v2549_v60 = vpop.f32.mrf.mxu1 }
 0xb78   : > { %v2605_v61 = vsel %vm1342_vm8, %v2549_v60, -3.4028235e+38 }
 0xb79   : > { %v3845_v62 = vpop.f32.mrf.mxu0  ;;  %v3850_v63 = vpop.f32.mrf.mxu1  ;;  %v2614_v1 = vsel %vm2607_vm9, %v2605_v61, -inf }
 0xb7a   : > { %2615 = vmax.xlane.f32.xlu0 %v2614_v1 }
 0xb7b   : > { %v2552_v2 = vpop.f32.mrf.mxu1  ;;  %v2595_v3 = vpop.f32.mrf.mxu0 }
 0xb7c   : > { %v2606_v4 = vsel %vm1342_vm8, %v2595_v3, -3.4028235e+38 }
 0xb7d   : > { %v3851_v5 = vpop.f32.mrf.mxu1  ;;  %v3856_v6 = vpop.f32.mrf.mxu0  ;;  %v2617_v7 = vsel %vm2607_vm9, %v2606_v4, -inf }
 0xb7e   : > { %2618 = vmax.xlane.f32.xlu1 %v2617_v7 }
 0xb7f   : > { %v2598_v8 = vpop.f32.mrf.mxu0 }
 0xb81   : > { %v3857_v10 = vpop.f32.mrf.mxu0 }
 0xb82   : > { %v4239_v10 = vld [vmem:[#allocation32 + $0x8] sm:$0xff]  }
 0xb8c   : > { %v2610_v11 = vpop.xlane.xlu1 %2609 }
 0xb8d   : > { %v2620_v12 = vsub.f32 %v2603_v50, %v2610_v11  ;;  %v4240_v11 = vld [vmem:[#allocation32] sm:$0xff]  }
 0xb8f   : > { %v2624_v13 = vmul.f32 1.442695, %v2620_v12 }
 0xb91   : > { %4267 = vpow2.f32 %v2624_v13 }
 0xb9e   : > { %v4268_v14 = vpop.eup %4267 }
 0xb9f   : > { %v2632_v15 = vsel %vm2607_vm9, %v4268_v14, 0.0 }
 0xba0   : > { %2633 = vadd.xlane.f32.xlu0 %v2632_v15 }
 0xbff   : > { %v2613_v16 = vpop.xlane.xlu0 %2612 }
 0xc00   : > { %v2621_v17 = vsub.f32 %v2604_v57, %v2613_v16 }
 0xc02   : > { %v2626_v18 = vmul.f32 1.442695, %v2621_v17 }
 0xc03   : > { %v2616_v19 = vpop.xlane.xlu0 %2615 }
 0xc04   : > { %4269 = vpow2.f32 %v2626_v18  ;;  %v2622_v20 = vsub.f32 %v2605_v61, %v2616_v19 }
 0xc06   : > { %v2628_v21 = vmul.f32 1.442695, %v2622_v20 }
 0xc07   : > { %v2619_v28 = vpop.xlane.xlu1 %2618 }
 0xc08   : > { %4271 = vpow2.f32 %v2628_v21  ;;  %v2623_v29 = vsub.f32 %v2606_v4, %v2619_v28 }
 0xc0a   : > { %v2630_v30 = vmul.f32 1.442695, %v2623_v29 }
 0xc11   : > { %v4270_v22 = vpop.eup %4269 }
 0xc12   : > { %v2635_v23 = vsel %vm2607_vm9, %v4270_v22, 0.0 }
 0xc13   : > { %2636 = vadd.xlane.f32.xlu1 %v2635_v23 }
 0xc15   : > { %v4272_v24 = vpop.eup %4271 }
 0xc16   : > { %v2638_v25 = vsel %vm2607_vm9, %v4272_v24, 0.0 }
 0xc17   : > { %2639 = vadd.xlane.f32.xlu0 %v2638_v25 }
 0xc24   : > { %4216 = vrot.lane.b32.xlu1 %v4215_v26, %s5032_s8  ;;  %s6020_s8 = sld [smem:[#allocation73_spill]] }
 0xc29   : > { %v2634_v27 = vpop.xlane.xlu0 %2633 }
 0xc2a   : > { %4273 = vrcp.f32 %v2634_v27  ;;  %v3637_v21 = vld [vmem:[%s6020_s8] ss:$0 sm:$0xff]  ;;  %s4809_s8 = scalar_lea.vmem %s5818_s5, 512 }
 0xc2b   : > { %4275 = vpow2.f32 %v2630_v30  ;;  %p4810_p2 = scmp.ne.s32.totalorder %s5818_s5, %s4809_s8 }
 0xc2d   : > { %4211 = vrot.lane.b32.xlu0 %v4215_v26, %s5031_s9  ;;  %s6019_s9 = smov 16   ;;  %p4811_p11 = pnand %p4810_p2, %p6025_p8 }
 0xc2f   : > { %p4812_p4 = pneg %p4811_p11 }
 0xc37   : > { %v4274_v31 = vpop.eup %4273 }
 0xc38   : > { %v2648_v32 = vmul.f32 %v4274_v31, %v4268_v14  ;;  %v4276_v34 = vpop.eup %4275 }
 0xc39   : > { %v2641_v35 = vsel %vm2607_vm9, %v4276_v34, 0.0 }
 0xc3a   : > { %2652 = vst.msk [vmem:[%s5754_s15] sm:$0xff] %vm2607_vm9, %v2648_v32  ;;  %v2656_v33 = vpack.c.bf16 %v2648_v32, %v2648_v32 }
 0xc3c   : > { %3861 = vmatmul.mubr.msk.bf16.vlgmr.msra.gmra.mxu1 %vm2607_vm9, %v2656_v33 }
 0xc3d   : > { %3872 = vmatprep.mubr.msk.bf16.mxu1 %vm5030_vm1, %v5029_v9 }
 0xc48   : > { %2642 = vadd.xlane.f32.xlu1 %v2641_v35  ;;  %v4243_v35 = vld [vmem:[%s6022_s10 + $0x18] sm:$0xff]  }
 0xc59   : > { %4221 = vrot.lane.b32.xlu1 %v4215_v26, %s5033_s20  ;;  %s6021_s20 = smov 24  }
 0xc9c   : > { %v2637_v37 = vpop.xlane.xlu1 %2636 }
 0xc9d   : > { %4277 = vrcp.f32 %v2637_v37  ;;  %v4244_v37 = vld [vmem:[%s6022_s10 + $0x10] sm:$0xff]  }
 0xca0   : > { %v2640_v38 = vpop.xlane.xlu0 %2639  ;;  %v4217_v39 = vpop.permute.xlu1 %4216 }
 0xca1   : > { %4279 = vrcp.f32 %v2640_v38  ;;  %v4219_v40 = vunpack.i.h.bf16 %v4217_v39  ;;  %v4218_v41 = vunpack.i.l.bf16 %v4217_v39 }
 0xca3   : > { %v2415_v42 = vpack.c.bf16 %v4219_v40, %v4218_v41 }
 0xca4   : > { %v4212_v43 = vpop.permute.xlu0 %4211 }
 0xca5   : > { %v4214_v44 = vunpack.i.h.bf16 %v4212_v43  ;;  %v4213_v45 = vunpack.i.l.bf16 %v4212_v43  ;;  %3871 = vmatpush3.bf16.msra.mxu1 %v2415_v42  ;;  %v3641_v42 = vld [vmem:[#allocation14] ss:$0 sm:$0xff] }
 0xca6   : > { %3882 = vmatprep.subr.bf16.mxu1 %v5029_v9 }
 0xca7   : > { %v2414_v0 = vpack.c.bf16 %v4214_v44, %v4213_v45  ;;  %v3642_v44 = vld [vmem:[#allocation15] ss:$0 sm:$0xff] }
 0xca9   : > { %3865 = vmatpush3.bf16.msra.mxu0 %v2414_v0 }
 0xcaa   : > { %v4278_v46 = vpop.eup %4277  ;;  %3876 = vmatprep.subr.bf16.mxu0 %v5029_v9 }
 0xcab   : > { %v2649_v47 = vmul.f32 %v4278_v46, %v4270_v22 }
 0xcad   : > { %2653 = vst.msk [vmem:[%s5754_s15 + $0x8] sm:$0xff] %vm2607_vm9, %v2649_v47  ;;  %v2657_v48 = vpack.c.bf16 %v2649_v47, %v2649_v47  ;;  %v4245_v47 = vld [vmem:[%s6022_s10 + $0x8] sm:$0xff]  }
 0xcae   : > { %v4280_v49 = vpop.eup %4279 }
 0xcaf   : > { %3867 = vmatmul.mubr.msk.bf16.vlgmr.msra.gmra.mxu0 %vm2607_vm9, %v2657_v48  ;;  %v2650_v50 = vmul.f32 %v4280_v49, %v4272_v24  ;;  %v4246_v48 = vld [vmem:[%s6022_s10] sm:$0xff]  }
 0xcb0   : > { %3878 = vmatprep.mubr.msk.bf16.mxu0 %vm5030_vm1, %v5029_v9  ;;  %v3643_v49 = vld [vmem:[%s6023_s7] ss:$0 sm:$0xff] }
 0xcb1   : > { %2654 = vst.msk [vmem:[%s5754_s15 + $0x10] sm:$0xff] %vm2607_vm9, %v2650_v50  ;;  %v2658_v52 = vpack.c.bf16 %v2650_v50, %v2650_v50 }
 0xcb3   : > { %3873 = vmatmul.mubr.msk.bf16.vlgmr.msra.gmra.mxu1 %vm2607_vm9, %v2658_v52 }
 0xcb4   : > { %3886 = vmatprep.mubr.msk.bf16.mxu1 %vm5030_vm1, %v5029_v9  ;;  %3883 = vmatpush3.bf16.msra.mxu1 %v4239_v10 }
 0xcb5   : > { %3884 = vmatprep.subr.bf16.mxu1 %v5029_v9 }
 0xcb8   : > { %3885 = vmatpush3.bf16.msra.mxu1 %v4240_v11 }
 0xcb9   : > { %3898 = vmatprep.subr.bf16.mxu1 %v5029_v9 }
 0xcd1   : > { %v2643_v53 = vpop.xlane.xlu1 %2642 }
 0xcd2   : > { %4281 = vrcp.f32 %v2643_v53 }
 0xcd5   : > { %v4222_v54 = vpop.permute.xlu1 %4221 }
 0xcd6   : > { %v4224_v55 = vunpack.i.h.bf16 %v4222_v54  ;;  %v4223_v56 = vunpack.i.l.bf16 %v4222_v54 }
 0xcd8   : > { %v2416_v57 = vpack.c.bf16 %v4224_v55, %v4223_v56 }
 0xcda   : > { %3877 = vmatpush3.bf16.msra.mxu0 %v2416_v57 }
 0xcdb   : > { %3890 = vmatprep.subr.bf16.mxu0 %v5029_v9 }
 0xcdf   : > { %v4282_v58 = vpop.eup %4281 }
 0xce0   : > { %v2651_v51 = vmul.f32 %v4282_v58, %v4276_v34  ;;  %v4241_v34 = vld [vmem:[#allocation33 + $0x8] sm:$0xff]  }
 0xce2   : > { %2655 = vst.msk [vmem:[%s5754_s15 + $0x18] sm:$0xff] %vm2607_vm9, %v2651_v51  ;;  %v2659_v59 = vpack.c.bf16 %v2651_v51, %v2651_v51 }
 0xce4   : > { %3879 = vmatmul.mubr.msk.bf16.vlgmr.msra.gmra.mxu0 %vm2607_vm9, %v2659_v59 }
 0xce5   : > { %3894 = vmatprep.mubr.msk.bf16.mxu0 %vm5030_vm1, %v5029_v9  ;;  %3891 = vmatpush3.bf16.msra.mxu0 %v4241_v34 }
 0xce6   : > { %3892 = vmatprep.subr.bf16.mxu0 %v5029_v9 }
 0xcfc   : > { %v2697_v60 = vpop.f32.mrf.mxu1 }
 0xcfd   : > { %2832 = vst.msk [vmem:[#allocation2] sm:$0xff] %vm1610_vm2, %v2697_v60 }
 0xcfe   : > { %v3862_v61 = vpop.f32.mrf.mxu1 }
 0xd00   : > { %v2700_v62 = vpop.f32.mrf.mxu1 }
 0xd02   : > { %v3863_v63 = vpop.f32.mrf.mxu1 }
 0xd6f   : > { %v2740_v1 = vpop.f32.mrf.mxu0 }
 0xd70   : > { %2834 = vrot.lane.b32.xlu0 %v2740_v1, %s5034_s12 }
 0xd71   : > { %v3868_v2 = vpop.f32.mrf.mxu0 }
 0xd73   : > { %v2743_v3 = vpop.f32.mrf.mxu0  ;;  %v2783_v4 = vpop.f32.mrf.mxu1 }
 0xd74   : > { %2839 = vrot.lane.b32.xlu1 %v2783_v4, %s6019_s9  ;;  %s5822_s9 = scalar_lea.sflag [#allocation37], %s6024_s6 }
 0xd75   : > { %v3869_v5 = vpop.f32.mrf.mxu0  ;;  %v3874_v6 = vpop.f32.mrf.mxu1 }
 0xd77   : > { %v2786_v7 = vpop.f32.mrf.mxu1 }
 0xd79   : > { %v3875_v8 = vpop.f32.mrf.mxu1 }
 0xda4   : > { %v2826_v12 = vpop.f32.mrf.mxu0 }
 0xda5   : > { %2844 = vrot.lane.b32.xlu0 %v2826_v12, %s6021_s20  ;;  %s5037_s20 = smov [#allocation36]  }
 0xda6   : > { %v3880_v13 = vpop.f32.mrf.mxu0  ;;  %s4813_s7 = sshll.u32 %s5037_s20, 4  ;;  %s4814_s7 = int_to_ptr.vmem [resolvable:$false] %s4813_s7 }
 0xda7   : > { %s4815_s14 = scalar_lea.vmem %s4814_s7, 1024  ;;  %p4816_p0 = scmp.lt.s32.totalorder %s5818_s5, %s4814_s7 }
 0xda8   : > { %v2829_v14 = vpop.f32.mrf.mxu0  ;;  %p4817_p9 = scmp.lt.s32.totalorder %s4815_s14, %s4809_s8 }
 0xdaa   : > { %v3881_v15 = vpop.f32.mrf.mxu0  ;;  %p4818_p7 = por %p4817_p9, %p4816_p0 }
 0xdac   : > { %p4819_p12 = pnand %p4818_p7, %p4812_p4 }
 0xde2   : > { %v2835_v16 = vpop.permute.xlu0 %2834 }
 0xde3   : > { %2837 = vst.msk [vmem:[#allocation2] sm:$0xff] %vm2043_vm5, %v2835_v16 }
 0xde6   : > { %v2840_v17 = vpop.permute.xlu1 %2839 }
 0xde7   : > { %2842 = vst.msk [vmem:[#allocation2] sm:$0xff] %vm2049_vm6, %v2840_v17 }
 0xe17   : > { %v2845_v18 = vpop.permute.xlu0 %2844 }
 0xe18   : > { %2847 = vst.msk [vmem:[#allocation2] sm:$0xff] %vm2055_vm7, %v2845_v18 }
 0xe1f   : > { %v2848_v19 = vld [vmem:[#allocation2] sm:$0xff] }
 0xe20   : > { %v2849_v20 = vpack.c.bf16 %v2848_v19, %v2848_v19 }
 0xe22   : > { %3887 = vmatmul.mubr.msk.bf16.vlgmr.msra.gmra.mxu1 %vm1345_vm0, %v2849_v20 }
 0xe23   : > { %3906 = vmatprep.mubr.msk.bf16.mxu1 %vm5030_vm1, %v5029_v9  ;;  %3899 = vmatpush3.bf16.msra.mxu1 %v4243_v35 }
 0xe24   : > { %3900 = vmatprep.subr.bf16.mxu1 %v5029_v9 }
 0xe27   : > { %3901 = vmatpush3.bf16.msra.mxu1 %v4244_v37 }
 0xe28   : > { %3902 = vmatprep.subr.bf16.mxu1 %v5029_v9 }
 0xe2b   : > { %3903 = vmatpush3.bf16.msra.mxu1 %v4245_v47 }
 0xe2c   : > { %3904 = vmatprep.subr.bf16.mxu1 %v5029_v9 }
 0xe2f   : > { %3905 = vmatpush3.bf16.msra.mxu1 %v4246_v48 }
 0xee2   : > { %v2910_v22 = vpop.f32.mrf.mxu1 }
 0xee3   : > { %v2911_v23 = vadd.f32 %v3637_v21, %v2910_v22 }
 0xee4   : > { %v3888_v24 = vpop.f32.mrf.mxu1 }
 0xee5   : > { %v5795_v25 = vadd.f32 %v2911_v23, %v5676_v36  ;;  %v4242_v36 = vld [vmem:[#allocation33] sm:$0xff]  }
 0xee6   : > { %v2913_v26 = vpop.f32.mrf.mxu1  ;;  %3893 = vmatpush3.bf16.msra.mxu0 %v4242_v36 }
 0xee7   : > { %v2919_v27 = vsel %vm1345_vm0, %v5795_v25, 0.0 }
 0xee8   : > { %2920 = vadd.xlane.f32.xlu1 %v2919_v27  ;;  %v3889_v28 = vpop.f32.mrf.mxu1 }
 0xf71   : > { %v2921_v29 = vpop.xlane.xlu1 %2920 }
 0xf72   : > { %v2922_v30 = vmul.f32 0.03125, %v2921_v29 }
 0xf74   : > { %v2923_v31 = vsub.f32 %v5795_v25, %v2922_v30 }
 0xf76   : > { %v2924_v32 = vmul.f32 %v2923_v31, %v2923_v31 }
 0xf78   : > { %v2925_v33 = vsel %vm1345_vm0, %v2924_v32, 0.0 }
 0xf79   : > { %2926 = vadd.xlane.f32.xlu0 %v2925_v33 }
0x1002   : > { %v2927_v38 = vpop.xlane.xlu0 %2926 }
0x1003   : > { %v2928_v39 = vmul.f32 0.03125, %v2927_v38 }
0x1005   : > { %v2929_v40 = vadd.f32 1e-12, %v2928_v39 }
0x1007   : > { %4283 = vrsqrt.f32 %v2929_v40 }
0x1014   : > { %v4284_v41 = vpop.eup %4283 }
0x1015   : > { %v2931_v43 = vmul.f32 %v4284_v41, %v2923_v31 }
0x1017   : > { %v2938_v45 = vmul.f32 %v3641_v42, %v2931_v43 }
0x1019   : > { %v2945_v0 = vadd.f32 %v3642_v44, %v2938_v45 }
0x101b   : > { %v2946_v46 = vpack.c.bf16 %v2945_v0, %v2945_v0 }
0x101d   : > { %3895 = vmatmul.mubr.msk.bf16.vlgmr.msra.gmra.mxu0 %vm1345_vm0, %v2946_v46 }
0x10dd   : > { %v3007_v50 = vpop.f32.mrf.mxu0 }
0x10de   : > { %v3008_v52 = vadd.f32 %v3643_v49, %v3007_v50 }
0x10df   : > { %v3896_v53 = vpop.f32.mrf.mxu0 }
0x10e0   : > { %v3013_v54 = vmax.f32 %v3008_v52, 0.0 }
0x10e1   : > { %v3010_v55 = vpop.f32.mrf.mxu0 }
0x10e2   : > { %v3014_v56 = vpack.c.bf16 %v3013_v54, %v3013_v54 }
0x10e3   : > { %v3897_v57 = vpop.f32.mrf.mxu0 }
0x10e4   : > { %3907 = vmatmul.mubr.msk.bf16.vlgmr.msra.gmra.mxu1 %vm3054_vm10, %v3014_v56 }
0x10e5   : > { %4822 = shalt.err (!%p4819_p12)
}
0x10e6   : > { %s4823_s6 = scalar_lea.hbm %s5816_s13, 512  ;;  %s4827_s4 = scalar_lea.hbm %s5204_s19, 1024 }
0x10e7   : > { %p4824_p5 = scmp.ne.s32.totalorder %s5816_s13, %s4823_s6  ;;  %p4828_p13 = scmp.lt.s32.totalorder %s5816_s13, %s5204_s19 }
0x10e8   : > { %p4829_p1 = scmp.lt.s32.totalorder %s4827_s4, %s4823_s6 }
0x10e9   : > { %p4825_p10 = pnand %p4824_p5, %p6025_p8 }
0x10ea   : > { %p4830_p3 = por %p4829_p1, %p4828_p13 }
0x10eb   : > { %p4826_p6 = pneg %p4825_p10 }
0x10ed   : > { %p4831_p2 = pnand %p4830_p3, %p4826_p6 }
0x10ef   : > { %4834 = shalt.err (!%p4831_p2)
}
0x10f0   : > { %s5038_s8 = smov 128   ;;  %s6026_s20 = sld [smem:[#allocation79_spill]] }
0x10f1   : > { %3987 = dma.vmem_to_hbm [thread:$0]  (%p6025_p8), %s5818_s5, 512, %s5816_s13, %s5822_s9, %s5038_s8, %s5038_s8, %s5034_s12  }
0x10f2   : > { %s6027_s7 = sshll.u32 %s5232_s11, 9  ;;  %s3153_s4 = sshll.u32 %s5754_s15, 4  ;;  %s3154_s4 = int_to_ptr.vmem [resolvable:$true] %s3153_s4 }
0x10f3   : > { %s4835_s6 = scalar_lea.vmem %s3154_s4, 512  ;;  %s5039_s3 = smov [#allocation38]  }
0x10f4   : > { %p4836_p11 = scmp.ne.s32.totalorder %s3154_s4, %s4835_s6  ;;  %s4839_s10 = sshll.u32 %s5039_s3, 4  ;;  %s4840_s10 = int_to_ptr.vmem [resolvable:$false] %s4839_s10 }
0x10f5   : > { %s4841_s17 = scalar_lea.vmem %s4840_s10, 1024  ;;  %p4842_p9 = scmp.lt.s32.totalorder %s3154_s4, %s4840_s10 }
0x10f6   : > { %s5847_s14 = scalar_lea.hbm %s6026_s20, %s6027_s7  ;;  %p4837_p4 = pnand %p4836_p11, %p6025_p8 }
0x10f7   : > { %p4843_p7 = scmp.lt.s32.totalorder %s4841_s17, %s4835_s6 }
0x10f8   : > { %p4838_p0 = pneg %p4837_p4 }
0x10f9   : > { %p4844_p12 = por %p4843_p7, %p4842_p9 }
0x10fb   : > { %p4845_p5 = pnand %p4844_p12, %p4838_p0 }
0x10fd   : > { %4848 = shalt.err (!%p4845_p5)
}
0x10fe   : > { %s4849_s15 = scalar_lea.hbm %s5847_s14, 512  ;;  %s4853_s5 = scalar_lea.hbm %s6026_s20, 1024 }
0x10ff   : > { %p4850_p10 = scmp.ne.s32.totalorder %s5847_s14, %s4849_s15  ;;  %p4854_p1 = scmp.lt.s32.totalorder %s5847_s14, %s6026_s20 }
0x1100   : > { %p4855_p3 = scmp.lt.s32.totalorder %s4853_s5, %s4849_s15 }
0x1101   : > { %p4851_p6 = pnand %p4850_p10, %p6025_p8 }
0x1102   : > { %p4856_p2 = por %p4855_p3, %p4854_p1 }
0x1103   : > { %p4852_p13 = pneg %p4851_p6 }
0x1105   : > { %p4857_p11 = pnand %p4856_p2, %p4852_p13 }
0x1107   : > { %4860 = shalt.err (!%p4857_p11)
}
0x1108   : > { %s6028_s3 = sld [smem:[#allocation77_spill]]  ;;  %s3656_s10 = sshll.u32 %s5232_s11, 7 }
0x1109   : > { %s6029_s17 = sld [smem:[#allocation78_spill]]  ;;  %s1311_s13 = scalar_lea.vmem [#allocation35], %s5489_s21 }
0x110a   : > { %3988 = dma.vmem_to_hbm [thread:$0]  (%p6025_p8), %s3154_s4, 512, %s5847_s14, %s5822_s9, %s5038_s8, %s5038_s8, %s5034_s12  }
0x110b   : > { %s3124_s7 = sshll.u32 %s1311_s13, 4  ;;  %s3101_s12 = scalar_lea.sflag [#allocation5], %s5486_s22  ;;  %s5873_s7 = int_to_ptr.vmem [resolvable:$true] %s3124_s7 }
0x110c   : > { %s4861_s9 = scalar_lea.vmem %s5873_s7, 128  ;;  %s5040_s11 = smov [#allocation35]  }
0x110d   : > { %p4862_p4 = scmp.ne.s32.totalorder %s5873_s7, %s4861_s9  ;;  %s4865_s21 = sshll.u32 %s5040_s11, 4  ;;  %s4866_s21 = int_to_ptr.vmem [resolvable:$false] %s4865_s21 }
0x110e   : > { %v3647_v9 = vld [vmem:[%s6028_s3] ss:$0 sm:$0xff]  ;;  %s4867_s8 = scalar_lea.vmem %s4866_s21, 256  ;;  %p4868_p7 = scmp.lt.s32.totalorder %s5873_s7, %s4866_s21 }
0x110f   : > { %s5871_s6 = scalar_lea.hbm %s6029_s17, %s3656_s10  ;;  %p4863_p0 = pnand %p4862_p4, %p6025_p8 }
0x1110   : > { %p4869_p12 = scmp.lt.s32.totalorder %s4867_s8, %s4861_s9 }
0x1111   : > { %p4864_p9 = pneg %p4863_p0 }
0x1112   : > { %p4870_p5 = por %p4869_p12, %p4868_p7 }
0x1114   : > { %p4871_p10 = pnand %p4870_p5, %p4864_p9 }
0x11a4   : > { %v3092_v58 = vpop.f32.mrf.mxu1 }
0x11a5   : > { %v3093_v51 = vadd.f32 %v3647_v9, %v3092_v58 }
0x11a6   : > { %v3908_v59 = vpop.f32.mrf.mxu1 }
0x11a7   : > { %v3098_v60 = vadd.f32 %v3093_v51, %v5795_v25 }
0x11a8   : > { %v3095_v61 = vpop.f32.mrf.mxu1 }
0x11a9   : > { %3099 = vst.msk [vmem:[%s1311_s13] sm:$0xff] %vm1345_vm0, %v3098_v60 }
0x11aa   : > { %v3909_v62 = vpop.f32.mrf.mxu1 }
0x11ab   : > { %4874 = shalt.err (!%p4871_p10)
}
0x11ac   : > { %s4875_s22 = scalar_lea.hbm %s5871_s6, 128  ;;  %s4879_s14 = scalar_lea.hbm %s6029_s17, 256 }
0x11ad   : > { %p4876_p6 = scmp.ne.s32.totalorder %s5871_s6, %s4875_s22  ;;  %p4880_p3 = scmp.lt.s32.totalorder %s5871_s6, %s6029_s17 }
0x11ae   : > { %p4881_p2 = scmp.lt.s32.totalorder %s4879_s14, %s4875_s22 }
0x11af   : > { %p4877_p13 = pnand %p4876_p6, %p6025_p8 }
0x11b0   : > { %p4882_p11 = por %p4881_p2, %p4880_p3 }
0x11b1   : > { %p4878_p1 = pneg %p4877_p13 }
0x11b3   : > { %p4883_p4 = pnand %p4882_p11, %p4878_p1 }
0x11b5   : > { %4886 = shalt.err (!%p4883_p4)
}
0x11b6   : > { %3986 = dma.vmem_to_hbm [thread:$0]  (%p6025_p8), %s5873_s7, 128, %s5871_s6, %s3101_s12  }
0x11b7 PF: > { %s3168_s4 = sand.u32 1, %s4961_s28   ;;  %p6030_p0 = scmp.ne.s32.totalorder %s5988_s23, 0 }
0x11b8   : > { %p6031_p9 = scmp.ge.s32.totalorder %s4973_s2, 2  ;;  %s3169_s15 = scalar_lea.sflag [#allocation5], %s3168_s4 }
0x11ba   : > { %p4055_p7 = pnand %p6031_p9, %p6030_p0 }
0x11bc   : > { %p4056_p12 = pneg %p4055_p7 }
0x11be   : > { %4952 = dma.done.wait (%p4056_p12), %s3169_s15, 128  }
0x11bf   : > { %4954 = vsyncadd (%p4056_p12), %s3169_s15, 4294967168  ;;  %s6032_s5 = sadd.s32 4294967294, %s4973_s2  }
0x11c0   : > { %s3177_s3 = sand.u32 1, %s6032_s5  }
0x11c1   : > { %s3178_s10 = scalar_lea.sflag [#allocation37], %s3177_s3 }
0x11c2   : > { %4956 = dma.done.wait (%p4056_p12), %s3178_s10, 1024  }
0x11c3   : > { %4958 = vsyncadd (%p4056_p12), %s3178_s10, 4294966272  ;;  %p94_p8 = scmp.ge.s32.totalorder %s5391_s26, 4   ;;  %s6033_s28 = smov %s4965_s0 }
0x11c4   : > { %s6034_s0 = smov %s4969_s1  ;;  %s6035_s1 = smov %s5402_s18 }
0x11c5   : > { %s6036_s2 = smov %s5391_s26  ;;  %96 = sbr.rel (!%p94_p8) target bundleno = 83 (0x53), region = 340 }
0x11ca   :  { %3192 = vsyncpa [#allocation4], 1 }
0x11cb   :  { %3194 = vsyncpa [#allocation4 + $0x1], 1 }
0x11cc   :  { %3195 = vsyncpa [#allocation7], 1 }
0x11cd   :  { %3197 = vsyncpa [#allocation7 + $0x1], 1 }
0x11ce   :  { %3198 = vsyncpa [#allocation10], 1 }
0x11cf   :  { %3199 = vsyncpa [#allocation13], 1 }
0x11d0   :  { %3200 = vsyncpa [#allocation16], 1 }
0x11d1   :  { %3201 = vsyncpa [#allocation19], 1 }
0x11d2   :  { %3202 = vsyncpa [#allocation22], 1 }
0x11d3   :  { %3203 = vsyncpa [#allocation25], 1 }
0x11d4   :  { %3204 = vsyncpa [#allocation28], 1 }
0x11d5   :  { %3205 = vsyncpa [#allocation31], 1 }
0x11d6   :  { %3206 = vsyncpa [#allocation34], 1 }
0x11d7   :  { %3207 = vsyncpa [#allocation5], 1 }
0x11d8   :  { %3209 = vsyncpa [#allocation5 + $0x1], 1 }
0x11d9   :  { %3210 = vsyncpa [#allocation37], 1 }
0x11da   :  { %3212 = vsyncpa [#allocation37 + $0x1], 1 }

</bundles_post_ra>
